<compile_context>
chip_gen: v6e
topology: v6e:2x2x1
jax: 0.10.0
libtpu: 0.0.40
codegen_flags: <defaults>
</compile_context>

<pallas_src>
import functools

import jax
import jax.numpy as jnp
from jax.experimental import pallas as pl
from jax.experimental.pallas import tpu as pltpu

# ----- module hyper-parameters (small, consistent with the torch module) -----
HIDDEN = 32          # hidden_dim
OBS_DIM = 11         # observation_dim  -> state input is 2*OBS_DIM = 22
ACT_DIM = 4          # action_dim
AEH = 128            # action_embed_hid
OUT_LIN = 128        # out_lin
NUM_BINS = 80
NBINS_PAD = 128      # bins padded to a full 128-lane vreg
LOW_ACT = -1.0
UP_ACT = 1.0
BIN_SIZE = (UP_ACT - LOW_ACT) / NUM_BINS
BATCH = 8
NEG_INF = -1e30      # padded-bin bias: can never win the Gumbel-max


def arinv_forward_kernel(x_ref,
                         se_w0, se_b0, se_w1, se_b1, se_w2, se_b2, se_w3, se_b3,
                         w1s_ref, b1_ref, w1a_ref, w2_ref, b2_ref,
                         lmw_ref, lmb_ref,
                         gum_ref, u_ref,
                         out_ref,
                         *, deterministic: bool):
    # ---- state_embed: Linear -> ReLU -> Linear -> ReLU -> Linear -> ReLU -> Linear ----
    h = jnp.maximum(
        jnp.dot(x_ref[...], se_w0[...], preferred_element_type=jnp.float32) + se_b0[...], 0.0)
    h = jnp.maximum(
        jnp.dot(h, se_w1[...], preferred_element_type=jnp.float32) + se_b1[...], 0.0)
    h = jnp.maximum(
        jnp.dot(h, se_w2[...], preferred_element_type=jnp.float32) + se_b2[...], 0.0)
    state_d = jnp.dot(h, se_w3[...], preferred_element_type=jnp.float32) + se_b3[...]  # (B, H)

    # Hoisted: state-side contribution (+ bias) of act_mod[i]'s first Linear, all heads
    # at once: (B, H) @ (H, ACT_DIM*AEH) -> (B, ACT_DIM*AEH). Off the serial chain.
    state_pre = (jnp.dot(state_d, w1s_ref[...], preferred_element_type=jnp.float32)
                 + b1_ref[...])                                                        # (B, 4*AEH)

    lm_w = lmw_ref[...]   # (ACT_DIM-1, ACT_DIM-1, OUT_LIN)
    lm_b = lmb_ref[...]   # (ACT_DIM-1, 1, OUT_LIN)

    acts = []  # list of (B, 1) sampled actions
    for i in range(ACT_DIM):                    # static unroll of the autoregressive loop
        pre_i = state_pre[:, i * AEH:(i + 1) * AEH]          # (B, AEH), 128-aligned slice
        if i == 0:
            # act_mod[0] only sees state_d (its first Linear has in_dim = HIDDEN).
            h1 = jnp.maximum(pre_i, 0.0)
        else:
            # lin_mod[i-1](a_prev): K <= 3, so do it as VPU broadcast-FMAs, no matmul.
            lin_out = lm_b[i - 1]                            # (1, OUT_LIN)
            for j in range(i):
                lin_out = lin_out + acts[j] * lm_w[i - 1, j]  # (B,1)*(OUT_LIN,) -> (B,OUT_LIN)
            h1 = jnp.maximum(
                pre_i + jnp.dot(lin_out, w1a_ref[i], preferred_element_type=jnp.float32), 0.0)

        logits = (jnp.dot(h1, w2_ref[i], preferred_element_type=jnp.float32)
                  + b2_ref[i])                               # (B, NBINS_PAD)

        # ---- Categorical(logits).sample() via Gumbel-max (noise precomputed outside) ----
        z = logits + gum_ref[i]                              # (B, NBINS_PAD)
        z_max = jnp.max(z, axis=1, keepdims=True)
        col = jax.lax.broadcasted_iota(jnp.int32, z.shape, 1)
        l_i = jnp.min(jnp.where(z >= z_max, col, NBINS_PAD), axis=1, keepdims=True)  # (B,1)
        l_f = l_i.astype(jnp.float32)

        if deterministic:
            a_i = LOW_ACT + (l_f + 0.5) * BIN_SIZE
        else:
            # Uniform(low + l*bin, low + (l+1)*bin).sample()
            a_i = LOW_ACT + (l_f + u_ref[:, i:i + 1]) * BIN_SIZE
        acts.append(a_i)
        out_ref[:, i:i + 1] = a_i                            # direct store, no final concat


def arinv_forward(comb_state, params, seed=0, deterministic=False):
    (se_w0, se_b0, se_w1, se_b1, se_w2, se_b2, se_w3, se_b3,
     am_w1, am_b1, am_w2, am_b2, lm_w, lm_b) = params
    B = comb_state.shape[0]

    # --- repack act_mod first-layer weights: split the K = HIDDEN + OUT_LIN matmul ---
    # state part, all heads stacked on the output axis: (HIDDEN, ACT_DIM*AEH)
    w1_state = jnp.transpose(am_w1[:, :HIDDEN, :], (1, 0, 2)).reshape(HIDDEN, ACT_DIM * AEH)
    b1_flat = am_b1.reshape(1, ACT_DIM * AEH)
    # action (lin_mod) part, per head: (ACT_DIM, OUT_LIN, AEH)
    w1_act = am_w1[:, HIDDEN:, :]

    # --- pad bins 80 -> 128; padded lanes get a -1e30 bias so they are never sampled ---
    w2_pad = jnp.pad(am_w2, ((0, 0), (0, 0), (0, NBINS_PAD - NUM_BINS)))
    b2_pad = jnp.pad(am_b2, ((0, 0), (0, 0), (0, NBINS_PAD - NUM_BINS)),
                     constant_values=NEG_INF)

    # --- all randomness generated once, outside the kernel (hoisted off the serial chain) ---
    key = jax.random.PRNGKey(seed)
    kg, ku = jax.random.split(key)
    gumbel = jax.random.gumbel(kg, (ACT_DIM, B, NBINS_PAD), jnp.float32)
    unif = jax.random.uniform(ku, (B, ACT_DIM), jnp.float32)

    args = [comb_state,
            se_w0, se_b0, se_w1, se_b1, se_w2, se_b2, se_w3, se_b3,
            w1_state, b1_flat, w1_act, w2_pad, b2_pad, lm_w, lm_b,
            gumbel, unif]
    vmem = pl.BlockSpec(memory_space=pltpu.MemorySpace.VMEM)
    return pl.pallas_call(
        functools.partial(arinv_forward_kernel, deterministic=deterministic),
        out_shape=jax.ShapeDtypeStruct((B, ACT_DIM), jnp.float32),
        in_specs=[vmem] * len(args),
        out_specs=vmem,
    )(*args)


def init_params(key):
    """Deterministic synthetic weights with the same shapes as ARInvModel.__init__."""
    keys = jax.random.split(key, 16)

    def lin(k, fan_in, shape):
        return jax.random.normal(k, shape, jnp.float32) / jnp.sqrt(float(fan_in))

    # state_embed
    se_w0 = lin(keys[0], 2 * OBS_DIM, (2 * OBS_DIM, HIDDEN))
    se_b0 = lin(keys[1], 2 * OBS_DIM, (1, HIDDEN)) * 0.1
    se_w1 = lin(keys[2], HIDDEN, (HIDDEN, HIDDEN))
    se_b1 = lin(keys[3], HIDDEN, (1, HIDDEN)) * 0.1
    se_w2 = lin(keys[4], HIDDEN, (HIDDEN, HIDDEN))
    se_b2 = lin(keys[5], HIDDEN, (1, HIDDEN)) * 0.1
    se_w3 = lin(keys[6], HIDDEN, (HIDDEN, HIDDEN))
    se_b3 = lin(keys[7], HIDDEN, (1, HIDDEN)) * 0.1

    # act_mod[i]: Linear(in_i, 128) -> ReLU -> Linear(128, 80); stacked & zero-padded.
    am_w1 = lin(keys[8], HIDDEN + OUT_LIN, (ACT_DIM, HIDDEN + OUT_LIN, AEH))
    am_w1 = am_w1.at[0, HIDDEN:, :].set(0.0)   # act_mod[0] has in_dim = HIDDEN only
    am_b1 = lin(keys[9], HIDDEN + OUT_LIN, (ACT_DIM, 1, AEH)) * 0.1
    am_w2 = lin(keys[10], AEH, (ACT_DIM, AEH, NUM_BINS))
    am_b2 = lin(keys[11], AEH, (ACT_DIM, 1, NUM_BINS)) * 0.1

    # lin_mod[j]: Linear(j+1, 128); stacked & zero-padded to (ACT_DIM-1, ACT_DIM-1, 128).
    lm_w = lin(keys[12], ACT_DIM - 1, (ACT_DIM - 1, ACT_DIM - 1, OUT_LIN))
    for j in range(ACT_DIM - 1):
        lm_w = lm_w.at[j, j + 1:, :].set(0.0)
    lm_b = lin(keys[13], ACT_DIM - 1, (ACT_DIM - 1, 1, OUT_LIN)) * 0.1

    return (se_w0, se_b0, se_w1, se_b1, se_w2, se_b2, se_w3, se_b3,
            am_w1, am_b1, am_w2, am_b2, lm_w, lm_b)


if __name__ == "__main__":
    key = jax.random.PRNGKey(0)
    pkey, xkey = jax.random.split(key)
    params = init_params(pkey)
    comb_state = jax.random.normal(xkey, (BATCH, 2 * OBS_DIM), jnp.float32)

    out = arinv_forward(comb_state, params, seed=0, deterministic=False)
    out = jax.block_until_ready(out)

    assert out.shape == (BATCH, ACT_DIM), out.shape
    assert bool(jnp.all(jnp.isfinite(out)))
    # every sampled action must land inside [low_act, up_act]
    assert bool(jnp.all((out >= LOW_ACT) & (out <= UP_ACT)))

    # deterministic path must also run and be bin-center valued
    out_d = jax.block_until_ready(arinv_forward(comb_state, params, seed=1, deterministic=True))
    assert bool(jnp.all((out_d >= LOW_ACT) & (out_d <= UP_ACT)))

    print("KERNEL_OK")
</pallas_src>

<mosaic_0001>
module attributes {stable_mosaic.version = 11 : i64} {
  func.func @arinv_forward_kernel(%arg0: memref<8x22xf32, #tpu.memory_space<vmem>>, %arg1: memref<22x32xf32, #tpu.memory_space<vmem>>, %arg2: memref<1x32xf32, #tpu.memory_space<vmem>>, %arg3: memref<32x32xf32, #tpu.memory_space<vmem>>, %arg4: memref<1x32xf32, #tpu.memory_space<vmem>>, %arg5: memref<32x32xf32, #tpu.memory_space<vmem>>, %arg6: memref<1x32xf32, #tpu.memory_space<vmem>>, %arg7: memref<32x32xf32, #tpu.memory_space<vmem>>, %arg8: memref<1x32xf32, #tpu.memory_space<vmem>>, %arg9: memref<32x512xf32, #tpu.memory_space<vmem>>, %arg10: memref<1x512xf32, #tpu.memory_space<vmem>>, %arg11: memref<4x128x128xf32, #tpu.memory_space<vmem>>, %arg12: memref<4x128x128xf32, #tpu.memory_space<vmem>>, %arg13: memref<4x1x128xf32, #tpu.memory_space<vmem>>, %arg14: memref<3x3x128xf32, #tpu.memory_space<vmem>>, %arg15: memref<3x1x128xf32, #tpu.memory_space<vmem>>, %arg16: memref<4x8x128xf32, #tpu.memory_space<vmem>>, %arg17: memref<8x4xf32, #tpu.memory_space<vmem>>, %arg18: memref<8x4xf32, #tpu.memory_space<vmem>>) attributes {dimension_semantics = [], scalar_prefetch = 0 : i64, scratch_operands = 0 : i64, tpu.core_type = #tpu.core_type<tc>} {
    %c0 = arith.constant 0 : index
    %c0_0 = arith.constant 0 : index
    %0 = vector.load %arg0[%c0, %c0_0] : memref<8x22xf32, #tpu.memory_space<vmem>>, vector<8x22xf32>
    %c0_1 = arith.constant 0 : index
    %c0_2 = arith.constant 0 : index
    %1 = vector.load %arg1[%c0_1, %c0_2] : memref<22x32xf32, #tpu.memory_space<vmem>>, vector<22x32xf32>
    %cst = arith.constant dense<0.000000e+00> : vector<8x32xf32>
    %2 = tpu.matmul %0, %1, %cst {dimension_numbers = #tpu.dot_dimension_numbers<[1], [0], [0], [1], [0, 0, 1, 1], [], []>} : vector<8x22xf32>, vector<22x32xf32>, vector<8x32xf32> -> vector<8x32xf32>
    %c0_3 = arith.constant 0 : index
    %c0_4 = arith.constant 0 : index
    %3 = vector.load %arg2[%c0_3, %c0_4] : memref<1x32xf32, #tpu.memory_space<vmem>>, vector<1x32xf32>
    %4 = vector.broadcast %3 : vector<1x32xf32> to vector<8x32xf32>
    %5 = arith.addf %2, %4 : vector<8x32xf32>
    %cst_5 = arith.constant 0.000000e+00 : f32
    %6 = vector.broadcast %cst_5 : f32 to vector<8x32xf32>
    %7 = arith.maximumf %5, %6 : vector<8x32xf32>
    %c0_6 = arith.constant 0 : index
    %c0_7 = arith.constant 0 : index
    %8 = vector.load %arg3[%c0_6, %c0_7] : memref<32x32xf32, #tpu.memory_space<vmem>>, vector<32x32xf32>
    %cst_8 = arith.constant dense<0.000000e+00> : vector<8x32xf32>
    %9 = tpu.matmul %7, %8, %cst_8 {dimension_numbers = #tpu.dot_dimension_numbers<[1], [0], [0], [1], [0, 0, 1, 1], [], []>} : vector<8x32xf32>, vector<32x32xf32>, vector<8x32xf32> -> vector<8x32xf32>
    %c0_9 = arith.constant 0 : index
    %c0_10 = arith.constant 0 : index
    %10 = vector.load %arg4[%c0_9, %c0_10] : memref<1x32xf32, #tpu.memory_space<vmem>>, vector<1x32xf32>
    %11 = vector.broadcast %10 : vector<1x32xf32> to vector<8x32xf32>
    %12 = arith.addf %9, %11 : vector<8x32xf32>
    %cst_11 = arith.constant 0.000000e+00 : f32
    %13 = vector.broadcast %cst_11 : f32 to vector<8x32xf32>
    %14 = arith.maximumf %12, %13 : vector<8x32xf32>
    %c0_12 = arith.constant 0 : index
    %c0_13 = arith.constant 0 : index
    %15 = vector.load %arg5[%c0_12, %c0_13] : memref<32x32xf32, #tpu.memory_space<vmem>>, vector<32x32xf32>
    %cst_14 = arith.constant dense<0.000000e+00> : vector<8x32xf32>
    %16 = tpu.matmul %14, %15, %cst_14 {dimension_numbers = #tpu.dot_dimension_numbers<[1], [0], [0], [1], [0, 0, 1, 1], [], []>} : vector<8x32xf32>, vector<32x32xf32>, vector<8x32xf32> -> vector<8x32xf32>
    %c0_15 = arith.constant 0 : index
    %c0_16 = arith.constant 0 : index
    %17 = vector.load %arg6[%c0_15, %c0_16] : memref<1x32xf32, #tpu.memory_space<vmem>>, vector<1x32xf32>
    %18 = vector.broadcast %17 : vector<1x32xf32> to vector<8x32xf32>
    %19 = arith.addf %16, %18 : vector<8x32xf32>
    %cst_17 = arith.constant 0.000000e+00 : f32
    %20 = vector.broadcast %cst_17 : f32 to vector<8x32xf32>
    %21 = arith.maximumf %19, %20 : vector<8x32xf32>
    %c0_18 = arith.constant 0 : index
    %c0_19 = arith.constant 0 : index
    %22 = vector.load %arg7[%c0_18, %c0_19] : memref<32x32xf32, #tpu.memory_space<vmem>>, vector<32x32xf32>
    %cst_20 = arith.constant dense<0.000000e+00> : vector<8x32xf32>
    %23 = tpu.matmul %21, %22, %cst_20 {dimension_numbers = #tpu.dot_dimension_numbers<[1], [0], [0], [1], [0, 0, 1, 1], [], []>} : vector<8x32xf32>, vector<32x32xf32>, vector<8x32xf32> -> vector<8x32xf32>
    %c0_21 = arith.constant 0 : index
    %c0_22 = arith.constant 0 : index
    %24 = vector.load %arg8[%c0_21, %c0_22] : memref<1x32xf32, #tpu.memory_space<vmem>>, vector<1x32xf32>
    %25 = vector.broadcast %24 : vector<1x32xf32> to vector<8x32xf32>
    %26 = arith.addf %23, %25 : vector<8x32xf32>
    %c0_23 = arith.constant 0 : index
    %c0_24 = arith.constant 0 : index
    %27 = vector.load %arg9[%c0_23, %c0_24] : memref<32x512xf32, #tpu.memory_space<vmem>>, vector<32x512xf32>
    %cst_25 = arith.constant dense<0.000000e+00> : vector<8x512xf32>
    %28 = tpu.matmul %26, %27, %cst_25 {dimension_numbers = #tpu.dot_dimension_numbers<[1], [0], [0], [1], [0, 0, 1, 1], [], []>} : vector<8x32xf32>, vector<32x512xf32>, vector<8x512xf32> -> vector<8x512xf32>
    %c0_26 = arith.constant 0 : index
    %c0_27 = arith.constant 0 : index
    %29 = vector.load %arg10[%c0_26, %c0_27] : memref<1x512xf32, #tpu.memory_space<vmem>>, vector<1x512xf32>
    %30 = vector.broadcast %29 : vector<1x512xf32> to vector<8x512xf32>
    %31 = arith.addf %28, %30 : vector<8x512xf32>
    %c0_28 = arith.constant 0 : index
    %c0_29 = arith.constant 0 : index
    %c0_30 = arith.constant 0 : index
    %32 = vector.load %arg14[%c0_28, %c0_29, %c0_30] : memref<3x3x128xf32, #tpu.memory_space<vmem>>, vector<3x3x128xf32>
    %c0_31 = arith.constant 0 : index
    %c0_32 = arith.constant 0 : index
    %c0_33 = arith.constant 0 : index
    %33 = vector.load %arg15[%c0_31, %c0_32, %c0_33] : memref<3x1x128xf32, #tpu.memory_space<vmem>>, vector<3x1x128xf32>
    %34 = vector.extract_strided_slice %31 {offsets = [0, 0], sizes = [8, 128], strides = [1, 1]} : vector<8x512xf32> to vector<8x128xf32>
    %cst_34 = arith.constant 0.000000e+00 : f32
    %35 = vector.broadcast %cst_34 : f32 to vector<8x128xf32>
    %36 = arith.maximumf %34, %35 : vector<8x128xf32>
    %c0_35 = arith.constant 0 : index
    %c0_36 = arith.constant 0 : index
    %c0_37 = arith.constant 0 : index
    %37 = vector.load %arg12[%c0_35, %c0_36, %c0_37] : memref<4x128x128xf32, #tpu.memory_space<vmem>>, vector<1x128x128xf32>
    %38 = vector.shape_cast %37 : vector<1x128x128xf32> to vector<128x128xf32>
    %cst_38 = arith.constant dense<0.000000e+00> : vector<8x128xf32>
    %39 = tpu.matmul %36, %38, %cst_38 {dimension_numbers = #tpu.dot_dimension_numbers<[1], [0], [0], [1], [0, 0, 1, 1], [], []>} : vector<8x128xf32>, vector<128x128xf32>, vector<8x128xf32> -> vector<8x128xf32>
    %c0_39 = arith.constant 0 : index
    %c0_40 = arith.constant 0 : index
    %c0_41 = arith.constant 0 : index
    %40 = vector.load %arg13[%c0_39, %c0_40, %c0_41] : memref<4x1x128xf32, #tpu.memory_space<vmem>>, vector<1x1x128xf32>
    %41 = vector.shape_cast %40 : vector<1x1x128xf32> to vector<1x128xf32>
    %42 = vector.broadcast %41 : vector<1x128xf32> to vector<8x128xf32>
    %43 = arith.addf %39, %42 : vector<8x128xf32>
    %c0_42 = arith.constant 0 : index
    %c0_43 = arith.constant 0 : index
    %c0_44 = arith.constant 0 : index
    %44 = vector.load %arg16[%c0_42, %c0_43, %c0_44] : memref<4x8x128xf32, #tpu.memory_space<vmem>>, vector<1x8x128xf32>
    %45 = vector.shape_cast %44 : vector<1x8x128xf32> to vector<8x128xf32>
    %46 = arith.addf %43, %45 : vector<8x128xf32>
    %cst_45 = arith.constant dense<0xFF800000> : vector<8xf32>
    %47 = vector.multi_reduction <maximumf>, %46, %cst_45 [1] : vector<8x128xf32> to vector<8xf32>
    %48 = vector.shape_cast %47 : vector<8xf32> to vector<8x1xf32>
    %49 = tpu.iota {dimensions = array<i32: 1>} : vector<8x128xi32>
    %50 = vector.broadcast %48 : vector<8x1xf32> to vector<8x128xf32>
    %51 = arith.cmpf oge, %46, %50 : vector<8x128xf32>
    %c128_i32 = arith.constant 128 : i32
    %52 = vector.broadcast %c128_i32 : i32 to vector<8x128xi32>
    %53 = arith.select %51, %49, %52 : vector<8x128xi1>, vector<8x128xi32>
    %cst_46 = arith.constant dense<2147483647> : vector<8xi32>
    %54 = vector.multi_reduction <minsi>, %53, %cst_46 [1] : vector<8x128xi32> to vector<8xi32>
    %55 = vector.shape_cast %54 : vector<8xi32> to vector<8x1xi32>
    %56 = arith.sitofp %55 : vector<8x1xi32> to vector<8x1xf32>
    %c0_47 = arith.constant 0 : index
    %c0_48 = arith.constant 0 : index
    %57 = vector.load %arg17[%c0_47, %c0_48] : memref<8x4xf32, #tpu.memory_space<vmem>>, vector<8x1xf32>
    %58 = arith.addf %56, %57 : vector<8x1xf32>
    %cst_49 = arith.constant 2.500000e-02 : f32
    %59 = vector.broadcast %cst_49 : f32 to vector<8x1xf32>
    %60 = arith.mulf %58, %59 : vector<8x1xf32>
    %cst_50 = arith.constant -1.000000e+00 : f32
    %61 = vector.broadcast %cst_50 : f32 to vector<8x1xf32>
    %62 = arith.addf %61, %60 : vector<8x1xf32>
    %c0_51 = arith.constant 0 : index
    %c0_52 = arith.constant 0 : index
    %63 = vector.load %arg18[%c0_51, %c0_52] : memref<8x4xf32, #tpu.memory_space<vmem>>, vector<8x1xf32>
    tpu.vector_store %arg18[%c0_51, %c0_52], %62 {strides = array<i32>} : memref<8x4xf32, #tpu.memory_space<vmem>>, vector<8x1xf32>,
    %64 = vector.extract_strided_slice %31 {offsets = [0, 128], sizes = [8, 128], strides = [1, 1]} : vector<8x512xf32> to vector<8x128xf32>
    %65 = vector.extract_strided_slice %33 {offsets = [0, 0, 0], sizes = [1, 1, 128], strides = [1, 1, 1]} : vector<3x1x128xf32> to vector<1x1x128xf32>
    %66 = vector.shape_cast %65 : vector<1x1x128xf32> to vector<1x128xf32>
    %67 = vector.extract_strided_slice %32 {offsets = [0, 0, 0], sizes = [1, 1, 128], strides = [1, 1, 1]} : vector<3x3x128xf32> to vector<1x1x128xf32>
    %68 = vector.shape_cast %67 : vector<1x1x128xf32> to vector<128xf32>
    %69 = vector.shape_cast %68 : vector<128xf32> to vector<1x128xf32>
    %70 = vector.broadcast %62 : vector<8x1xf32> to vector<8x128xf32>
    %71 = vector.broadcast %69 : vector<1x128xf32> to vector<8x128xf32>
    %72 = arith.mulf %70, %71 : vector<8x128xf32>
    %73 = vector.broadcast %66 : vector<1x128xf32> to vector<8x128xf32>
    %74 = arith.addf %73, %72 : vector<8x128xf32>
    %c1 = arith.constant 1 : index
    %c0_53 = arith.constant 0 : index
    %c0_54 = arith.constant 0 : index
    %75 = vector.load %arg11[%c1, %c0_53, %c0_54] : memref<4x128x128xf32, #tpu.memory_space<vmem>>, vector<1x128x128xf32>
    %76 = vector.shape_cast %75 : vector<1x128x128xf32> to vector<128x128xf32>
    %cst_55 = arith.constant dense<0.000000e+00> : vector<8x128xf32>
    %77 = tpu.matmul %74, %76, %cst_55 {dimension_numbers = #tpu.dot_dimension_numbers<[1], [0], [0], [1], [0, 0, 1, 1], [], []>} : vector<8x128xf32>, vector<128x128xf32>, vector<8x128xf32> -> vector<8x128xf32>
    %78 = arith.addf %64, %77 : vector<8x128xf32>
    %cst_56 = arith.constant 0.000000e+00 : f32
    %79 = vector.broadcast %cst_56 : f32 to vector<8x128xf32>
    %80 = arith.maximumf %78, %79 : vector<8x128xf32>
    %c1_57 = arith.constant 1 : index
    %c0_58 = arith.constant 0 : index
    %c0_59 = arith.constant 0 : index
    %81 = vector.load %arg12[%c1_57, %c0_58, %c0_59] : memref<4x128x128xf32, #tpu.memory_space<vmem>>, vector<1x128x128xf32>
    %82 = vector.shape_cast %81 : vector<1x128x128xf32> to vector<128x128xf32>
    %cst_60 = arith.constant dense<0.000000e+00> : vector<8x128xf32>
    %83 = tpu.matmul %80, %82, %cst_60 {dimension_numbers = #tpu.dot_dimension_numbers<[1], [0], [0], [1], [0, 0, 1, 1], [], []>} : vector<8x128xf32>, vector<128x128xf32>, vector<8x128xf32> -> vector<8x128xf32>
    %c1_61 = arith.constant 1 : index
    %c0_62 = arith.constant 0 : index
    %c0_63 = arith.constant 0 : index
    %84 = vector.load %arg13[%c1_61, %c0_62, %c0_63] : memref<4x1x128xf32, #tpu.memory_space<vmem>>, vector<1x1x128xf32>
    %85 = vector.shape_cast %84 : vector<1x1x128xf32> to vector<1x128xf32>
    %86 = vector.broadcast %85 : vector<1x128xf32> to vector<8x128xf32>
    %87 = arith.addf %83, %86 : vector<8x128xf32>
    %c1_64 = arith.constant 1 : index
    %c0_65 = arith.constant 0 : index
    %c0_66 = arith.constant 0 : index
    %88 = vector.load %arg16[%c1_64, %c0_65, %c0_66] : memref<4x8x128xf32, #tpu.memory_space<vmem>>, vector<1x8x128xf32>
    %89 = vector.shape_cast %88 : vector<1x8x128xf32> to vector<8x128xf32>
    %90 = arith.addf %87, %89 : vector<8x128xf32>
    %cst_67 = arith.constant dense<0xFF800000> : vector<8xf32>
    %91 = vector.multi_reduction <maximumf>, %90, %cst_67 [1] : vector<8x128xf32> to vector<8xf32>
    %92 = vector.shape_cast %91 : vector<8xf32> to vector<8x1xf32>
    %93 = tpu.iota {dimensions = array<i32: 1>} : vector<8x128xi32>
    %94 = vector.broadcast %92 : vector<8x1xf32> to vector<8x128xf32>
    %95 = arith.cmpf oge, %90, %94 : vector<8x128xf32>
    %c128_i32_68 = arith.constant 128 : i32
    %96 = vector.broadcast %c128_i32_68 : i32 to vector<8x128xi32>
    %97 = arith.select %95, %93, %96 : vector<8x128xi1>, vector<8x128xi32>
    %cst_69 = arith.constant dense<2147483647> : vector<8xi32>
    %98 = vector.multi_reduction <minsi>, %97, %cst_69 [1] : vector<8x128xi32> to vector<8xi32>
    %99 = vector.shape_cast %98 : vector<8xi32> to vector<8x1xi32>
    %100 = arith.sitofp %99 : vector<8x1xi32> to vector<8x1xf32>
    %c0_70 = arith.constant 0 : index
    %c1_71 = arith.constant 1 : index
    %101 = vector.load %arg17[%c0_70, %c1_71] : memref<8x4xf32, #tpu.memory_space<vmem>>, vector<8x1xf32>
    %102 = arith.addf %100, %101 : vector<8x1xf32>
    %cst_72 = arith.constant 2.500000e-02 : f32
    %103 = vector.broadcast %cst_72 : f32 to vector<8x1xf32>
    %104 = arith.mulf %102, %103 : vector<8x1xf32>
    %cst_73 = arith.constant -1.000000e+00 : f32
    %105 = vector.broadcast %cst_73 : f32 to vector<8x1xf32>
    %106 = arith.addf %105, %104 : vector<8x1xf32>
    %c0_74 = arith.constant 0 : index
    %c1_75 = arith.constant 1 : index
    %107 = vector.load %arg18[%c0_74, %c1_75] : memref<8x4xf32, #tpu.memory_space<vmem>>, vector<8x1xf32>
    tpu.vector_store %arg18[%c0_74, %c1_75], %106 {strides = array<i32>} : memref<8x4xf32, #tpu.memory_space<vmem>>, vector<8x1xf32>,
    %108 = vector.extract_strided_slice %31 {offsets = [0, 256], sizes = [8, 128], strides = [1, 1]} : vector<8x512xf32> to vector<8x128xf32>
    %109 = vector.extract_strided_slice %33 {offsets = [1, 0, 0], sizes = [1, 1, 128], strides = [1, 1, 1]} : vector<3x1x128xf32> to vector<1x1x128xf32>
    %110 = vector.shape_cast %109 : vector<1x1x128xf32> to vector<1x128xf32>
    %111 = vector.extract_strided_slice %32 {offsets = [1, 0, 0], sizes = [1, 1, 128], strides = [1, 1, 1]} : vector<3x3x128xf32> to vector<1x1x128xf32>
    %112 = vector.shape_cast %111 : vector<1x1x128xf32> to vector<128xf32>
    %113 = vector.shape_cast %112 : vector<128xf32> to vector<1x128xf32>
    %114 = vector.broadcast %62 : vector<8x1xf32> to vector<8x128xf32>
    %115 = vector.broadcast %113 : vector<1x128xf32> to vector<8x128xf32>
    %116 = arith.mulf %114, %115 : vector<8x128xf32>
    %117 = vector.broadcast %110 : vector<1x128xf32> to vector<8x128xf32>
    %118 = arith.addf %117, %116 : vector<8x128xf32>
    %119 = vector.extract_strided_slice %32 {offsets = [1, 1, 0], sizes = [1, 1, 128], strides = [1, 1, 1]} : vector<3x3x128xf32> to vector<1x1x128xf32>
    %120 = vector.shape_cast %119 : vector<1x1x128xf32> to vector<128xf32>
    %121 = vector.shape_cast %120 : vector<128xf32> to vector<1x128xf32>
    %122 = vector.broadcast %106 : vector<8x1xf32> to vector<8x128xf32>
    %123 = vector.broadcast %121 : vector<1x128xf32> to vector<8x128xf32>
    %124 = arith.mulf %122, %123 : vector<8x128xf32>
    %125 = arith.addf %118, %124 : vector<8x128xf32>
    %c2 = arith.constant 2 : index
    %c0_76 = arith.constant 0 : index
    %c0_77 = arith.constant 0 : index
    %126 = vector.load %arg11[%c2, %c0_76, %c0_77] : memref<4x128x128xf32, #tpu.memory_space<vmem>>, vector<1x128x128xf32>
    %127 = vector.shape_cast %126 : vector<1x128x128xf32> to vector<128x128xf32>
    %cst_78 = arith.constant dense<0.000000e+00> : vector<8x128xf32>
    %128 = tpu.matmul %125, %127, %cst_78 {dimension_numbers = #tpu.dot_dimension_numbers<[1], [0], [0], [1], [0, 0, 1, 1], [], []>} : vector<8x128xf32>, vector<128x128xf32>, vector<8x128xf32> -> vector<8x128xf32>
    %129 = arith.addf %108, %128 : vector<8x128xf32>
    %cst_79 = arith.constant 0.000000e+00 : f32
    %130 = vector.broadcast %cst_79 : f32 to vector<8x128xf32>
    %131 = arith.maximumf %129, %130 : vector<8x128xf32>
    %c2_80 = arith.constant 2 : index
    %c0_81 = arith.constant 0 : index
    %c0_82 = arith.constant 0 : index
    %132 = vector.load %arg12[%c2_80, %c0_81, %c0_82] : memref<4x128x128xf32, #tpu.memory_space<vmem>>, vector<1x128x128xf32>
    %133 = vector.shape_cast %132 : vector<1x128x128xf32> to vector<128x128xf32>
    %cst_83 = arith.constant dense<0.000000e+00> : vector<8x128xf32>
    %134 = tpu.matmul %131, %133, %cst_83 {dimension_numbers = #tpu.dot_dimension_numbers<[1], [0], [0], [1], [0, 0, 1, 1], [], []>} : vector<8x128xf32>, vector<128x128xf32>, vector<8x128xf32> -> vector<8x128xf32>
    %c2_84 = arith.constant 2 : index
    %c0_85 = arith.constant 0 : index
    %c0_86 = arith.constant 0 : index
    %135 = vector.load %arg13[%c2_84, %c0_85, %c0_86] : memref<4x1x128xf32, #tpu.memory_space<vmem>>, vector<1x1x128xf32>
    %136 = vector.shape_cast %135 : vector<1x1x128xf32> to vector<1x128xf32>
    %137 = vector.broadcast %136 : vector<1x128xf32> to vector<8x128xf32>
    %138 = arith.addf %134, %137 : vector<8x128xf32>
    %c2_87 = arith.constant 2 : index
    %c0_88 = arith.constant 0 : index
    %c0_89 = arith.constant 0 : index
    %139 = vector.load %arg16[%c2_87, %c0_88, %c0_89] : memref<4x8x128xf32, #tpu.memory_space<vmem>>, vector<1x8x128xf32>
    %140 = vector.shape_cast %139 : vector<1x8x128xf32> to vector<8x128xf32>
    %141 = arith.addf %138, %140 : vector<8x128xf32>
    %cst_90 = arith.constant dense<0xFF800000> : vector<8xf32>
    %142 = vector.multi_reduction <maximumf>, %141, %cst_90 [1] : vector<8x128xf32> to vector<8xf32>
    %143 = vector.shape_cast %142 : vector<8xf32> to vector<8x1xf32>
    %144 = tpu.iota {dimensions = array<i32: 1>} : vector<8x128xi32>
    %145 = vector.broadcast %143 : vector<8x1xf32> to vector<8x128xf32>
    %146 = arith.cmpf oge, %141, %145 : vector<8x128xf32>
    %c128_i32_91 = arith.constant 128 : i32
    %147 = vector.broadcast %c128_i32_91 : i32 to vector<8x128xi32>
    %148 = arith.select %146, %144, %147 : vector<8x128xi1>, vector<8x128xi32>
    %cst_92 = arith.constant dense<2147483647> : vector<8xi32>
    %149 = vector.multi_reduction <minsi>, %148, %cst_92 [1] : vector<8x128xi32> to vector<8xi32>
    %150 = vector.shape_cast %149 : vector<8xi32> to vector<8x1xi32>
    %151 = arith.sitofp %150 : vector<8x1xi32> to vector<8x1xf32>
    %c0_93 = arith.constant 0 : index
    %c2_94 = arith.constant 2 : index
    %152 = vector.load %arg17[%c0_93, %c2_94] : memref<8x4xf32, #tpu.memory_space<vmem>>, vector<8x1xf32>
    %153 = arith.addf %151, %152 : vector<8x1xf32>
    %cst_95 = arith.constant 2.500000e-02 : f32
    %154 = vector.broadcast %cst_95 : f32 to vector<8x1xf32>
    %155 = arith.mulf %153, %154 : vector<8x1xf32>
    %cst_96 = arith.constant -1.000000e+00 : f32
    %156 = vector.broadcast %cst_96 : f32 to vector<8x1xf32>
    %157 = arith.addf %156, %155 : vector<8x1xf32>
    %c0_97 = arith.constant 0 : index
    %c2_98 = arith.constant 2 : index
    %158 = vector.load %arg18[%c0_97, %c2_98] : memref<8x4xf32, #tpu.memory_space<vmem>>, vector<8x1xf32>
    tpu.vector_store %arg18[%c0_97, %c2_98], %157 {strides = array<i32>} : memref<8x4xf32, #tpu.memory_space<vmem>>, vector<8x1xf32>,
    %159 = vector.extract_strided_slice %31 {offsets = [0, 384], sizes = [8, 128], strides = [1, 1]} : vector<8x512xf32> to vector<8x128xf32>
    %160 = vector.extract_strided_slice %33 {offsets = [2, 0, 0], sizes = [1, 1, 128], strides = [1, 1, 1]} : vector<3x1x128xf32> to vector<1x1x128xf32>
    %161 = vector.shape_cast %160 : vector<1x1x128xf32> to vector<1x128xf32>
    %162 = vector.extract_strided_slice %32 {offsets = [2, 0, 0], sizes = [1, 1, 128], strides = [1, 1, 1]} : vector<3x3x128xf32> to vector<1x1x128xf32>
    %163 = vector.shape_cast %162 : vector<1x1x128xf32> to vector<128xf32>
    %164 = vector.shape_cast %163 : vector<128xf32> to vector<1x128xf32>
    %165 = vector.broadcast %62 : vector<8x1xf32> to vector<8x128xf32>
    %166 = vector.broadcast %164 : vector<1x128xf32> to vector<8x128xf32>
    %167 = arith.mulf %165, %166 : vector<8x128xf32>
    %168 = vector.broadcast %161 : vector<1x128xf32> to vector<8x128xf32>
    %169 = arith.addf %168, %167 : vector<8x128xf32>
    %170 = vector.extract_strided_slice %32 {offsets = [2, 1, 0], sizes = [1, 1, 128], strides = [1, 1, 1]} : vector<3x3x128xf32> to vector<1x1x128xf32>
    %171 = vector.shape_cast %170 : vector<1x1x128xf32> to vector<128xf32>
    %172 = vector.shape_cast %171 : vector<128xf32> to vector<1x128xf32>
    %173 = vector.broadcast %106 : vector<8x1xf32> to vector<8x128xf32>
    %174 = vector.broadcast %172 : vector<1x128xf32> to vector<8x128xf32>
    %175 = arith.mulf %173, %174 : vector<8x128xf32>
    %176 = arith.addf %169, %175 : vector<8x128xf32>
    %177 = vector.extract_strided_slice %32 {offsets = [2, 2, 0], sizes = [1, 1, 128], strides = [1, 1, 1]} : vector<3x3x128xf32> to vector<1x1x128xf32>
    %178 = vector.shape_cast %177 : vector<1x1x128xf32> to vector<128xf32>
    %179 = vector.shape_cast %178 : vector<128xf32> to vector<1x128xf32>
    %180 = vector.broadcast %157 : vector<8x1xf32> to vector<8x128xf32>
    %181 = vector.broadcast %179 : vector<1x128xf32> to vector<8x128xf32>
    %182 = arith.mulf %180, %181 : vector<8x128xf32>
    %183 = arith.addf %176, %182 : vector<8x128xf32>
    %c3 = arith.constant 3 : index
    %c0_99 = arith.constant 0 : index
    %c0_100 = arith.constant 0 : index
    %184 = vector.load %arg11[%c3, %c0_99, %c0_100] : memref<4x128x128xf32, #tpu.memory_space<vmem>>, vector<1x128x128xf32>
    %185 = vector.shape_cast %184 : vector<1x128x128xf32> to vector<128x128xf32>
    %cst_101 = arith.constant dense<0.000000e+00> : vector<8x128xf32>
    %186 = tpu.matmul %183, %185, %cst_101 {dimension_numbers = #tpu.dot_dimension_numbers<[1], [0], [0], [1], [0, 0, 1, 1], [], []>} : vector<8x128xf32>, vector<128x128xf32>, vector<8x128xf32> -> vector<8x128xf32>
    %187 = arith.addf %159, %186 : vector<8x128xf32>
    %cst_102 = arith.constant 0.000000e+00 : f32
    %188 = vector.broadcast %cst_102 : f32 to vector<8x128xf32>
    %189 = arith.maximumf %187, %188 : vector<8x128xf32>
    %c3_103 = arith.constant 3 : index
    %c0_104 = arith.constant 0 : index
    %c0_105 = arith.constant 0 : index
    %190 = vector.load %arg12[%c3_103, %c0_104, %c0_105] : memref<4x128x128xf32, #tpu.memory_space<vmem>>, vector<1x128x128xf32>
    %191 = vector.shape_cast %190 : vector<1x128x128xf32> to vector<128x128xf32>
    %cst_106 = arith.constant dense<0.000000e+00> : vector<8x128xf32>
    %192 = tpu.matmul %189, %191, %cst_106 {dimension_numbers = #tpu.dot_dimension_numbers<[1], [0], [0], [1], [0, 0, 1, 1], [], []>} : vector<8x128xf32>, vector<128x128xf32>, vector<8x128xf32> -> vector<8x128xf32>
    %c3_107 = arith.constant 3 : index
    %c0_108 = arith.constant 0 : index
    %c0_109 = arith.constant 0 : index
    %193 = vector.load %arg13[%c3_107, %c0_108, %c0_109] : memref<4x1x128xf32, #tpu.memory_space<vmem>>, vector<1x1x128xf32>
    %194 = vector.shape_cast %193 : vector<1x1x128xf32> to vector<1x128xf32>
    %195 = vector.broadcast %194 : vector<1x128xf32> to vector<8x128xf32>
    %196 = arith.addf %192, %195 : vector<8x128xf32>
    %c3_110 = arith.constant 3 : index
    %c0_111 = arith.constant 0 : index
    %c0_112 = arith.constant 0 : index
    %197 = vector.load %arg16[%c3_110, %c0_111, %c0_112] : memref<4x8x128xf32, #tpu.memory_space<vmem>>, vector<1x8x128xf32>
    %198 = vector.shape_cast %197 : vector<1x8x128xf32> to vector<8x128xf32>
    %199 = arith.addf %196, %198 : vector<8x128xf32>
    %cst_113 = arith.constant dense<0xFF800000> : vector<8xf32>
    %200 = vector.multi_reduction <maximumf>, %199, %cst_113 [1] : vector<8x128xf32> to vector<8xf32>
    %201 = vector.shape_cast %200 : vector<8xf32> to vector<8x1xf32>
    %202 = tpu.iota {dimensions = array<i32: 1>} : vector<8x128xi32>
    %203 = vector.broadcast %201 : vector<8x1xf32> to vector<8x128xf32>
    %204 = arith.cmpf oge, %199, %203 : vector<8x128xf32>
    %c128_i32_114 = arith.constant 128 : i32
    %205 = vector.broadcast %c128_i32_114 : i32 to vector<8x128xi32>
    %206 = arith.select %204, %202, %205 : vector<8x128xi1>, vector<8x128xi32>
    %cst_115 = arith.constant dense<2147483647> : vector<8xi32>
    %207 = vector.multi_reduction <minsi>, %206, %cst_115 [1] : vector<8x128xi32> to vector<8xi32>
    %208 = vector.shape_cast %207 : vector<8xi32> to vector<8x1xi32>
    %209 = arith.sitofp %208 : vector<8x1xi32> to vector<8x1xf32>
    %c0_116 = arith.constant 0 : index
    %c3_117 = arith.constant 3 : index
    %210 = vector.load %arg17[%c0_116, %c3_117] : memref<8x4xf32, #tpu.memory_space<vmem>>, vector<8x1xf32>
    %211 = arith.addf %209, %210 : vector<8x1xf32>
    %cst_118 = arith.constant 2.500000e-02 : f32
    %212 = vector.broadcast %cst_118 : f32 to vector<8x1xf32>
    %213 = arith.mulf %211, %212 : vector<8x1xf32>
    %cst_119 = arith.constant -1.000000e+00 : f32
    %214 = vector.broadcast %cst_119 : f32 to vector<8x1xf32>
    %215 = arith.addf %214, %213 : vector<8x1xf32>
    %c0_120 = arith.constant 0 : index
    %c3_121 = arith.constant 3 : index
    %216 = vector.load %arg18[%c0_120, %c3_121] : memref<8x4xf32, #tpu.memory_space<vmem>>, vector<8x1xf32>
    tpu.vector_store %arg18[%c0_120, %c3_121], %215 {strides = array<i32>} : memref<8x4xf32, #tpu.memory_space<vmem>>, vector<8x1xf32>,
    return
  }
}

</mosaic_0001>

<bundles_post_ra>
// kernel: tpu_custom_call.1
= control target key start
LH: loop header
LB: loop body
LE: loop exit
PB: predicated region body
PF: predicated region fallthrough
CT: control target
= control target key end

     0   :  { %s2821_s0 = inlined_call_operand.vmem [shape: f32[8,22], index: 0, kind: input, shape index: {}]   ;;  %s2822_s1 = inlined_call_operand.hbm [shape: f32[22,32], index: 1, kind: input, shape index: {}]   ;;  %s2823_s2 = inlined_call_operand.vmem [shape: f32[1,32], index: 2, kind: input, shape index: {}]   ;;  %s2824_s3 = inlined_call_operand.hbm [shape: f32[32,32], index: 3, kind: input, shape index: {}]   ;;  %s2825_s4 = inlined_call_operand.hbm [shape: f32[1,32], index: 4, kind: input, shape index: {}]   ;;  %s2826_s5 = inlined_call_operand.hbm [shape: f32[32,32], index: 5, kind: input, shape index: {}]   ;;  %s2827_s6 = inlined_call_operand.hbm [shape: f32[1,32], index: 6, kind: input, shape index: {}]   ;;  %s2828_s7 = inlined_call_operand.hbm [shape: f32[32,32], index: 7, kind: input, shape index: {}]   ;;  %s2829_s8 = inlined_call_operand.hbm [shape: f32[1,32], index: 8, kind: input, shape index: {}]   ;;  %s2830_s9 = inlined_call_operand.hbm [shape: f32[32,512], index: 9, kind: input, shape index: {}]   ;;  %s2831_s10 = inlined_call_operand.hbm [shape: f32[1,512], index: 10, kind: input, shape index: {}]   ;;  %s2832_s11 = inlined_call_operand.hbm [shape: f32[4,128,128], index: 11, kind: input, shape index: {}]   ;;  %s2833_s12 = inlined_call_operand.hbm [shape: f32[4,128,128], index: 12, kind: input, shape index: {}]   ;;  %s2834_s13 = inlined_call_operand.hbm [shape: f32[4,1,128], index: 13, kind: input, shape index: {}]   ;;  %s2835_s14 = inlined_call_operand.hbm [shape: f32[3,3,128], index: 14, kind: input, shape index: {}]   ;;  %s2836_s15 = inlined_call_operand.hbm [shape: f32[3,1,128], index: 15, kind: input, shape index: {}]   ;;  %s2837_s16 = inlined_call_operand.vmem [shape: f32[4,8,128], index: 16, kind: input, shape index: {}]   ;;  %s2838_s17 = inlined_call_operand.vmem [shape: f32[8,4], index: 17, kind: input, shape index: {}]   ;;  %s2839_s18 = inlined_call_operand.vmem [shape: f32[8,4], index: 18, kind: output, shape index: {}]  }
   0x1   :  { %2840 = sst [smem:[#allocation32_spill]] %s2821_s0 }
   0x2   :  { %2841 = sst [smem:[#allocation33_spill]] %s2822_s1 }
   0x3   :  { %2842 = sst [smem:[#allocation34_spill]] %s2823_s2 }
   0x4   :  { %23 = vsyncpa [#allocation3], 0 }
   0x5   :  { %24 = vsyncpa [#allocation5], 0 }
   0x6   :  { %25 = vsyncpa [#allocation8], 0 }
   0x7   :  { %26 = vsyncpa [#allocation11], 0 }
   0x8   :  { %27 = vsyncpa [#allocation14], 0 }
   0x9   :  { %28 = vsyncpa [#allocation17], 0 }
   0xa   :  { %29 = vsyncpa [#allocation20], 0 }
   0xb   :  { %30 = vsyncpa [#allocation23], 0  ;;  %s2387_s27 = smov [#allocation4]   ;;  %s2388_s29 = smov [#allocation7]  }
   0xc   :  { %s52_s28 = sshll.u32 %s2387_s27, 4  ;;  %s74_s30 = sshll.u32 %s2388_s29, 4  ;;  %s53_s28 = int_to_ptr.vmem [resolvable:$true] %s52_s28  ;;  %s75_s30 = int_to_ptr.vmem [resolvable:$true] %s74_s30 }
   0xd   :  { %s2099_s0 = scalar_lea.vmem %s53_s28, 512  ;;  %p2104_p1 = scmp.lt.s32.totalorder %s53_s28, %s53_s28 }
   0xe   :  { %p2100_p0 = scmp.ne.s32.totalorder %s53_s28, %s2099_s0  ;;  %p2105_p2 = scmp.lt.s32.totalorder %s2099_s0, %s2099_s0 }
  0x10   :  { %p2106_p3 = por %p2105_p2, %p2104_p1 }
  0x12   :  { %p2107_p4 = pnand %p2106_p3, %p2100_p0 }
  0x14   :  { %2110 = shalt.err (!%p2107_p4)
}
  0x15   :  { %s2389_s19 = smov 128   ;;  %s2390_s1 = smov 8  }
  0x16   :  { %58 = dma.hbm_to_vmem [thread:$0]  %s2824_s3, 512, %s53_s28, [#allocation5], %s2389_s19, %s2389_s19, %s2390_s1  }
  0x17   :  { %s2119_s22 = scalar_lea.vmem %s75_s30, 512  ;;  %p2124_p6 = scmp.lt.s32.totalorder %s75_s30, %s75_s30 }
  0x18   :  { %p2120_p5 = scmp.ne.s32.totalorder %s75_s30, %s2119_s22  ;;  %p2125_p7 = scmp.lt.s32.totalorder %s2119_s22, %s2119_s22 }
  0x1a   :  { %p2126_p8 = por %p2125_p7, %p2124_p6 }
  0x1c   :  { %p2127_p9 = pnand %p2126_p8, %p2120_p5 }
  0x1e   :  { %2130 = shalt.err (!%p2127_p9)
}
  0x1f   :  { %80 = dma.hbm_to_vmem [thread:$0]  %s2826_s5, 512, %s75_s30, [#allocation8], %s2389_s19, %s2389_s19, %s2390_s1  }
  0x20   :  { %s2391_s24 = smov [#allocation10]   ;;  %s2392_s26 = smov [#allocation13]  }
  0x21   :  { %s96_s25 = sshll.u32 %s2391_s24, 4  ;;  %s118_s27 = sshll.u32 %s2392_s26, 4  ;;  %s97_s25 = int_to_ptr.vmem [resolvable:$true] %s96_s25  ;;  %s119_s27 = int_to_ptr.vmem [resolvable:$true] %s118_s27 }
  0x22   :  { %s2139_s3 = scalar_lea.vmem %s97_s25, 512  ;;  %p2144_p11 = scmp.lt.s32.totalorder %s97_s25, %s97_s25 }
  0x23   :  { %p2140_p10 = scmp.ne.s32.totalorder %s97_s25, %s2139_s3  ;;  %p2145_p12 = scmp.lt.s32.totalorder %s2139_s3, %s2139_s3 }
  0x25   :  { %p2146_p13 = por %p2145_p12, %p2144_p11 }
  0x27   :  { %p2147_p0 = pnand %p2146_p13, %p2140_p10 }
  0x29   :  { %2150 = shalt.err (!%p2147_p0)
}
  0x2a   :  { %102 = dma.hbm_to_vmem [thread:$0]  %s2828_s7, 512, %s97_s25, [#allocation11], %s2389_s19, %s2389_s19, %s2390_s1  }
  0x2b   :  { %s2159_s5 = scalar_lea.vmem %s119_s27, 2048  ;;  %p2164_p2 = scmp.lt.s32.totalorder %s119_s27, %s119_s27 }
  0x2c   :  { %p2160_p1 = scmp.ne.s32.totalorder %s119_s27, %s2159_s5  ;;  %p2165_p3 = scmp.lt.s32.totalorder %s2159_s5, %s2159_s5 }
  0x2e   :  { %p2166_p4 = por %p2165_p3, %p2164_p2 }
  0x30   :  { %p2167_p5 = pnand %p2166_p4, %p2160_p1 }
  0x32   :  { %2170 = shalt.err (!%p2167_p5)
}
  0x33   :  { %s2393_s30 = smov 512   ;;  %s2394_s0 = smov 32  }
  0x34   :  { %124 = dma.hbm_to_vmem [thread:$0]  %s2830_s9, 2048, %s119_s27, [#allocation14], %s2393_s30, %s2393_s30, %s2394_s0  }
  0x35   :  { %s2395_s22 = smov [#allocation16]   ;;  %s2396_s23 = smov [#allocation19]  }
  0x36   :  { %s140_s2 = sshll.u32 %s2395_s22, 4  ;;  %s164_s24 = sshll.u32 %s2396_s23, 4  ;;  %s141_s2 = int_to_ptr.vmem [resolvable:$true] %s140_s2  ;;  %s165_s24 = int_to_ptr.vmem [resolvable:$true] %s164_s24 }
  0x37   :  { %s2179_s7 = scalar_lea.vmem %s141_s2, 8192  ;;  %p2184_p7 = scmp.lt.s32.totalorder %s141_s2, %s141_s2 }
  0x38   :  { %p2180_p6 = scmp.ne.s32.totalorder %s141_s2, %s2179_s7  ;;  %p2185_p8 = scmp.lt.s32.totalorder %s2179_s7, %s2179_s7 }
  0x3a   :  { %p2186_p9 = por %p2185_p8, %p2184_p7 }
  0x3c   :  { %p2187_p10 = pnand %p2186_p9, %p2180_p6 }
  0x3e   :  { %2190 = shalt.err (!%p2187_p10)
}
  0x3f   :  { %146 = dma.hbm_to_vmem [thread:$0]  %s2832_s11, 8192, %s141_s2, [#allocation17], %s2389_s19, %s2389_s19, %s2390_s1  }
  0x40   :  { %s2199_s9 = scalar_lea.vmem %s165_s24, 64  ;;  %p2204_p12 = scmp.lt.s32.totalorder %s165_s24, %s165_s24 }
  0x41   :  { %p2200_p11 = scmp.ne.s32.totalorder %s165_s24, %s2199_s9  ;;  %p2205_p13 = scmp.lt.s32.totalorder %s2199_s9, %s2199_s9 }
  0x43   :  { %p2206_p0 = por %p2205_p13, %p2204_p12 }
  0x45   :  { %p2207_p1 = pnand %p2206_p0, %p2200_p11 }
  0x47   :  { %2210 = shalt.err (!%p2207_p1)
}
  0x48   :  { %s2397_s27 = smov 16   ;;  %s2398_s3 = smov 1  }
  0x49   :  { %170 = dma.hbm_to_vmem [thread:$0]  %s2834_s13, 64, %s165_s24, [#allocation20], %s2397_s27, %s2397_s27, %s2398_s3  }
  0x4a   :  { %s2399_s5 = smov [#allocation2]   ;;  %s2400_s0 = smov [#allocation6]  }
  0x4b   :  { %s38_s30 = sshll.u32 %s2399_s5, 4  ;;  %s65_s11 = sshll.u32 %s2400_s0, 4  ;;  %s39_s30 = int_to_ptr.vmem [resolvable:$true] %s38_s30  ;;  %s66_s11 = int_to_ptr.vmem [resolvable:$true] %s65_s11 }
  0x4c   :  { %s2219_s20 = scalar_lea.vmem %s39_s30, 384  ;;  %p2224_p3 = scmp.lt.s32.totalorder %s39_s30, %s39_s30 }
  0x4d   :  { %p2220_p2 = scmp.ne.s32.totalorder %s39_s30, %s2219_s20  ;;  %p2225_p4 = scmp.lt.s32.totalorder %s2219_s20, %s2219_s20 }
  0x4f   :  { %p2226_p5 = por %p2225_p4, %p2224_p3 }
  0x51   :  { %p2227_p6 = pnand %p2226_p5, %p2220_p2 }
  0x53   :  { %2230 = shalt.err (!%p2227_p6)
}
  0x54   :  { %s2843_s2 = sld [smem:[#allocation33_spill]]  ;;  %s2239_s13 = scalar_lea.vmem %s66_s11, 16 }
  0x55   :  { %p2240_p7 = scmp.ne.s32.totalorder %s66_s11, %s2239_s13  ;;  %s2243_s23 = scalar_lea.vmem %s66_s11, 32 }
  0x56   :  { %p2244_p8 = scmp.lt.s32.totalorder %s66_s11, %s66_s11  ;;  %p2245_p9 = scmp.lt.s32.totalorder %s2243_s23, %s2239_s13 }
  0x58   :  { %p2246_p10 = por %p2245_p9, %p2244_p8 }
  0x5a   :  { %44 = dma.hbm_to_vmem [thread:$0]  %s2843_s2, 384, %s39_s30, [#allocation3], %s2389_s19, %s2389_s19, %s2390_s1  }
  0x5b   :  { %p2247_p11 = pnand %p2246_p10, %p2240_p7 }
  0x5d   :  { %2250 = shalt.err (!%p2247_p11)
}
  0x5e   :  { %68 = dma.hbm_to_vmem [thread:$0]  %s2825_s4, 16, %s66_s11, [#allocation5]  }
  0x5f   :  { %s2401_s25 = smov [#allocation9]   ;;  %s2402_s9 = smov [#allocation12]  }
  0x60   :  { %s87_s26 = sshll.u32 %s2401_s25, 4  ;;  %s109_s28 = sshll.u32 %s2402_s9, 4  ;;  %s88_s26 = int_to_ptr.vmem [resolvable:$true] %s87_s26  ;;  %s110_s28 = int_to_ptr.vmem [resolvable:$true] %s109_s28 }
  0x61   :  { %s2259_s29 = scalar_lea.vmem %s88_s26, 16  ;;  %s2263_s5 = scalar_lea.vmem %s88_s26, 32 }
  0x62   :  { %p2260_p12 = scmp.ne.s32.totalorder %s88_s26, %s2259_s29  ;;  %p2264_p13 = scmp.lt.s32.totalorder %s88_s26, %s88_s26 }
  0x63   :  { %p2265_p0 = scmp.lt.s32.totalorder %s2263_s5, %s2259_s29 }
  0x65   :  { %p2266_p1 = por %p2265_p0, %p2264_p13 }
  0x67   :  { %p2267_p2 = pnand %p2266_p1, %p2260_p12 }
  0x69   :  { %2270 = shalt.err (!%p2267_p2)
}
  0x6a   :  { %90 = dma.hbm_to_vmem [thread:$0]  %s2827_s6, 16, %s88_s26, [#allocation8]  }
  0x6b   :  { %s2279_s20 = scalar_lea.vmem %s110_s28, 16  ;;  %s2283_s4 = scalar_lea.vmem %s110_s28, 32 }
  0x6c   :  { %p2280_p3 = scmp.ne.s32.totalorder %s110_s28, %s2279_s20  ;;  %p2284_p4 = scmp.lt.s32.totalorder %s110_s28, %s110_s28 }
  0x6d   :  { %p2285_p5 = scmp.lt.s32.totalorder %s2283_s4, %s2279_s20 }
  0x6f   :  { %p2286_p6 = por %p2285_p5, %p2284_p4 }
  0x71   :  { %p2287_p7 = pnand %p2286_p6, %p2280_p3 }
  0x73   :  { %2290 = shalt.err (!%p2287_p7)
}
  0x74   :  { %112 = dma.hbm_to_vmem [thread:$0]  %s2829_s8, 16, %s110_s28, [#allocation11]  }
  0x75   :  { %s2403_s22 = smov [#allocation15]   ;;  %s2404_s13 = smov [#allocation18]  }
  0x76   :  { %s131_s2 = sshll.u32 %s2403_s22, 4  ;;  %s152_s23 = sshll.u32 %s2404_s13, 4  ;;  %s132_s2 = int_to_ptr.vmem [resolvable:$true] %s131_s2  ;;  %s153_s23 = int_to_ptr.vmem [resolvable:$true] %s152_s23 }
  0x77   :  { %s2299_s24 = scalar_lea.vmem %s132_s2, 64  ;;  %p2304_p9 = scmp.lt.s32.totalorder %s132_s2, %s132_s2 }
  0x78   :  { %p2300_p8 = scmp.ne.s32.totalorder %s132_s2, %s2299_s24  ;;  %p2305_p10 = scmp.lt.s32.totalorder %s2299_s24, %s2299_s24 }
  0x7a   :  { %p2306_p11 = por %p2305_p10, %p2304_p9 }
  0x7c   :  { %p2307_p12 = pnand %p2306_p11, %p2300_p8 }
  0x7e   :  { %2310 = shalt.err (!%p2307_p12)
}
  0x7f   :  { %134 = dma.hbm_to_vmem [thread:$0]  %s2831_s10, 64, %s132_s2, [#allocation14]  }
  0x80   :  { %s2319_s25 = scalar_lea.vmem %s153_s23, 8192  ;;  %p2324_p0 = scmp.lt.s32.totalorder %s153_s23, %s153_s23 }
  0x81   :  { %p2320_p13 = scmp.ne.s32.totalorder %s153_s23, %s2319_s25  ;;  %p2325_p1 = scmp.lt.s32.totalorder %s2319_s25, %s2319_s25 }
  0x83   :  { %p2326_p2 = por %p2325_p1, %p2324_p0 }
  0x85   :  { %p2327_p3 = pnand %p2326_p2, %p2320_p13 }
  0x87   :  { %2330 = shalt.err (!%p2327_p3)
}
  0x88   :  { %158 = dma.hbm_to_vmem [thread:$0]  %s2833_s12, 8192, %s153_s23, [#allocation17], %s2389_s19, %s2389_s19, %s2390_s1  }
  0x89   :  { %s2405_s9 = smov [#allocation21]  }
  0x8a   :  { %s176_s28 = sshll.u32 %s2405_s9, 4  ;;  %s177_s28 = int_to_ptr.vmem [resolvable:$true] %s176_s28 }
  0x8b   :  { %s2339_s29 = scalar_lea.vmem %s177_s28, 192  ;;  %p2344_p5 = scmp.lt.s32.totalorder %s177_s28, %s177_s28 }
  0x8c   :  { %p2340_p4 = scmp.ne.s32.totalorder %s177_s28, %s2339_s29  ;;  %p2345_p6 = scmp.lt.s32.totalorder %s2339_s29, %s2339_s29 }
  0x8e   :  { %p2346_p7 = por %p2345_p6, %p2344_p5 }
  0x90   :  { %p2347_p8 = pnand %p2346_p7, %p2340_p4 }
  0x92   :  { %2350 = shalt.err (!%p2347_p8)
}
  0x93   :  { %s2406_s10 = smov 64   ;;  %s2407_s5 = smov 4  }
  0x94   :  { %182 = dma.hbm_to_vmem [thread:$0]  %s2835_s14, 192, %s177_s28, [#allocation20], %s2406_s10, %s2406_s10, %s2407_s5  }
  0x95   :  { %s2408_s20 = smov [#allocation22]  }
  0x96   :  { %s188_s4 = sshll.u32 %s2408_s20, 4  ;;  %s189_s4 = int_to_ptr.vmem [resolvable:$true] %s188_s4 }
  0x97   :  { %s2359_s12 = scalar_lea.vmem %s189_s4, 48  ;;  %s2363_s19 = scalar_lea.vmem %s189_s4, 64 }
  0x98   :  { %p2360_p9 = scmp.ne.s32.totalorder %s189_s4, %s2359_s12  ;;  %p2364_p10 = scmp.lt.s32.totalorder %s189_s4, %s189_s4 }
  0x99   :  { %p2365_p11 = scmp.lt.s32.totalorder %s2363_s19, %s2359_s12 }
  0x9b   :  { %p2366_p12 = por %p2365_p11, %p2364_p10 }
  0x9d   :  { %p2367_p13 = pnand %p2366_p12, %p2360_p9 }
  0x9f   :  { %2370 = shalt.err (!%p2367_p13)
}
  0xa0   :  { %194 = dma.hbm_to_vmem [thread:$0]  %s2836_s15, 48, %s189_s4, [#allocation23], %s2397_s27, %s2397_s27, %s2398_s3  }
  0xa1   :  { %2371 = dma.done.wait [#allocation3], 384  }
  0xa2   :  { %2372 = vsyncadd [#allocation3], 4294966912 }
  0xa3   :  { %2373 = dma.done.wait [#allocation5], 528  }
  0xa4   :  { %2374 = vsyncadd [#allocation5], 4294966768 }
  0xa5   :  { %2375 = dma.done.wait [#allocation8], 528  }
  0xa6   :  { %2376 = vsyncadd [#allocation8], 4294966768 }
  0xa7   :  { %2377 = dma.done.wait [#allocation11], 528  }
  0xa8   :  { %2378 = vsyncadd [#allocation11], 4294966768 }
  0xa9   :  { %2379 = dma.done.wait [#allocation14], 2112  }
  0xaa   :  { %2380 = vsyncadd [#allocation14], 4294965184 }
  0xab   :  { %2381 = dma.done.wait [#allocation17], 16384  }
  0xac   :  { %2382 = vsyncadd [#allocation17], 4294950912 }
  0xad   :  { %2383 = dma.done.wait [#allocation20], 256  }
  0xae   :  { %2384 = vsyncadd [#allocation20], 4294967040 }
  0xaf   :  { %2385 = dma.done.wait [#allocation23], 48  }
  0xb0   :  { %2386 = vsyncadd [#allocation23], 4294967248  ;;  %v2409_v0 = vmov 0.0   ;;  %vm2410_vm0 = vmmov 0   ;;  %vm256_vm1 = vcmask 1045504   ;;  %v243_v2 = vld [vmem:[#allocation2 + $0x8] sm:$0xff] }
  0xb1   :  { %1774 = vmatprep.subr.mxu1 %v2409_v0  ;;  %1780 = vmatprep.mubr.msk.f32.mxu1 %vm2410_vm0, %v2409_v0  ;;  %v244_v1 = vld [vmem:[#allocation2 + $0x10] sm:$0x3f]  ;;  %v242_v3 = vld [vmem:[#allocation2] sm:$0xff]  ;;  %s2844_s27 = sld [smem:[#allocation32_spill]]  ;;  %vm252_vm2 = vcmask 179200   ;;  %v333_v6 = vld [vmem:[#allocation4 + $0x10] sm:$0xff] }
  0xb2   :  { %691 = vmatprep.mubr.f32.mxu0 %v2409_v0  ;;  %1775 = vmatpush3.msk.msra.mxu1 %vm256_vm1, %v244_v1  ;;  %v334_v5 = vld [vmem:[#allocation4 + $0x18] sm:$0xff]  ;;  %v332_v7 = vld [vmem:[#allocation4 + $0x8] sm:$0xff]  ;;  %v331_v8 = vld [vmem:[#allocation4] sm:$0xff]  ;;  %s2845_s22 = sld [smem:[#allocation34_spill]]  ;;  %vm342_vm3 = vcmask 261120   ;;  %vm896_vm6 = vcmask 7168  }
  0xb3   :  { %1776 = vmatprep.subr.mxu1 %v2409_v0  ;;  %v420_v14 = vld [vmem:[#allocation7 + $0x18] sm:$0xff]  ;;  %v419_v15 = vld [vmem:[#allocation7 + $0x10] sm:$0xff]  ;;  %v418_v16 = vld [vmem:[#allocation7 + $0x8] sm:$0xff]  ;;  %vm1125_vm9 = vcmask 15368   ;;  %vm1360_vm12 = vcmask 23568   ;;  %vm1601_vm15 = vcmask 31768  }
  0xb4   :  { %1777 = vmatpush3.msra.mxu1 %v243_v2  ;;  %v417_v17 = vld [vmem:[#allocation7] sm:$0xff]  ;;  %v1618_v18 = vld [vmem:[#allocation6] ss:$0 sm:$0xff]  ;;  %v504_v24 = vld [vmem:[#allocation10 + $0x10] sm:$0xff] }
  0xb5   :  { %1778 = vmatprep.subr.mxu1 %v2409_v0  ;;  %v505_v23 = vld [vmem:[#allocation10 + $0x18] sm:$0xff]  ;;  %v503_v25 = vld [vmem:[#allocation10 + $0x8] sm:$0xff]  ;;  %v502_v26 = vld [vmem:[#allocation10] sm:$0xff] }
  0xb6   :  { %1779 = vmatpush3.msra.mxu1 %v242_v3  ;;  %v599_v27 = vld [vmem:[#allocation13 + $0x68] sm:$0xff]  ;;  %v601_v28 = vld [vmem:[#allocation13 + $0x78] sm:$0xff]  ;;  %v598_v29 = vld [vmem:[#allocation13 + $0x60] sm:$0xff] }
  0xb7   :  { %v241_v4 = vld [vmem:[%s2844_s27] sm:$0xff]  ;;  %1783 = vmatprep.subr.mxu1 %v2409_v0  ;;  %651 = vmatprep.subr.mxu0 %v599_v27  ;;  %v1620_v33 = vld [vmem:[#allocation9] ss:$0 sm:$0xff]  ;;  %v600_v38 = vld [vmem:[#allocation13 + $0x70] sm:$0xff] }
  0xb8   :  { %1781 = vmatmul.mubr.msk.f32.vlgmr.msra.gmra.mxu1 %vm252_vm2, %v241_v4  ;;  %v1615_v9 = vld [vmem:[%s2845_s22] ss:$0 sm:$0xff]  ;;  %v595_v30 = vld [vmem:[#allocation13 + $0x48] sm:$0xff]  ;;  %652 = vmatpush1.msra.mxu0 %v598_v29  ;;  %v597_v39 = vld [vmem:[#allocation13 + $0x58] sm:$0xff]  ;;  %v2411_v29 = vmov 0  }
  0xb9   :  { %1784 = vmatpush3.msra.mxu1 %v334_v5  ;;  %1791 = vmatprep.mubr.msk.f32.mxu1 %vm2410_vm0, %v2409_v0  ;;  %v594_v31 = vld [vmem:[#allocation13 + $0x40] sm:$0xff]  ;;  %v591_v32 = vld [vmem:[#allocation13 + $0x28] sm:$0xff]  ;;  %v596_v40 = vld [vmem:[#allocation13 + $0x50] sm:$0xff]  ;;  %v604_v5 = vlaneseq }
  0xba   :  { %1785 = vmatprep.subr.mxu1 %v2409_v0  ;;  %653 = vmatprep.subr.mxu0 %v595_v30  ;;  %v593_v41 = vld [vmem:[#allocation13 + $0x38] sm:$0xff]  ;;  %v590_v42 = vld [vmem:[#allocation13 + $0x20] sm:$0xff]  ;;  %v592_v43 = vld [vmem:[#allocation13 + $0x30] sm:$0xff] }
  0xbb   :  { %1786 = vmatpush3.msra.mxu1 %v333_v6  ;;  %654 = vmatpush1.msra.mxu0 %v594_v31  ;;  %v587_v44 = vld [vmem:[#allocation13 + $0x8] sm:$0xff]  ;;  %v589_v45 = vld [vmem:[#allocation13 + $0x18] sm:$0xff]  ;;  %v586_v46 = vld [vmem:[#allocation13] sm:$0xff]  ;;  %v2633_v6 = vshrl.u32 %v604_v5, 7 }
  0xbc   :  { %1787 = vmatprep.subr.mxu1 %v2409_v0  ;;  %655 = vmatprep.subr.mxu0 %v591_v32  ;;  %v588_v47 = vld [vmem:[#allocation13 + $0x10] sm:$0xff]  ;;  %v1622_v48 = vld [vmem:[#allocation12] ss:$0 sm:$0xff]  ;;  %v788_v55 = vld [vmem:[#allocation18 + $0x60] sm:$0xff] }
  0xbd   :  { %1788 = vmatpush3.msra.mxu1 %v332_v7  ;;  %656 = vmatpush1.msra.mxu0 %v590_v42  ;;  %v791_v51 = vld [vmem:[#allocation18 + $0x78] sm:$0xff]  ;;  %v790_v53 = vld [vmem:[#allocation18 + $0x70] sm:$0xff]  ;;  %v789_v54 = vld [vmem:[#allocation18 + $0x68] sm:$0xff]  ;;  %v2636_v7 = vsub.s32 0, %v2633_v6 }
  0xbe   :  { %1789 = vmatprep.subr.mxu1 %v2409_v0  ;;  %657 = vmatprep.subr.mxu0 %v587_v44  ;;  %v787_v56 = vld [vmem:[#allocation18 + $0x58] sm:$0xff]  ;;  %v786_v57 = vld [vmem:[#allocation18 + $0x50] sm:$0xff]  ;;  %v785_v58 = vld [vmem:[#allocation18 + $0x48] sm:$0xff] }
  0xbf   :  { %1790 = vmatpush3.msra.mxu1 %v331_v8  ;;  %658 = vmatpush1.msra.mxu0 %v586_v46  ;;  %v784_v59 = vld [vmem:[#allocation18 + $0x40] sm:$0xff]  ;;  %v783_v60 = vld [vmem:[#allocation18 + $0x38] sm:$0xff]  ;;  %v782_v61 = vld [vmem:[#allocation18 + $0x30] sm:$0xff] }
  0xc0   :  { %1794 = vmatprep.subr.mxu1 %v2409_v0  ;;  %1816 = vmatprep.subr.mxu0 %v2409_v0  ;;  %v781_v62 = vld [vmem:[#allocation18 + $0x28] sm:$0xff]  ;;  %v780_v63 = vld [vmem:[#allocation18 + $0x20] sm:$0xff]  ;;  %v779_v1 = vld [vmem:[#allocation18 + $0x18] sm:$0xff] }
  0xc1   :  { %v778_v2 = vld [vmem:[#allocation18 + $0x10] sm:$0xff]  ;;  %v777_v3 = vld [vmem:[#allocation18 + $0x8] sm:$0xff]  ;;  %v776_v4 = vld [vmem:[#allocation18] sm:$0xff]  ;;  %2088 = vset.pattern.permute.xlu1 %v2411_v29 }
  0xc2   :  { %v2638_v8 = vld [vmem:[#allocation15] sm:$0xf]  ;;  %v930_v31 = vld [vmem:[#allocation16 + $0xf0] sm:$0xff]  ;;  %v929_v32 = vld [vmem:[#allocation16 + $0xe8] sm:$0xff] }
  0xc3   :  { %v931_v30 = vld [vmem:[#allocation16 + $0xf8] sm:$0xff]  ;;  %v1628_v29 = vld [vmem:[#allocation19 + $0x1] ss:$0 sm:$0xff] }
  0xc4   :  { %v919_v42 = vld [vmem:[#allocation16 + $0x98] sm:$0xff] }
 0x178   :  { %v326_v10 = vpop.f32.mrf.mxu1 }
 0x179   :  { %v327_v11 = vadd.f32 %v1615_v9, %v326_v10  ;;  %v607_v9 = vrot.slane %v2638_v8, %v2636_v7 }
 0x17a   :  { %v1782_v12 = vpop.f32.mrf.mxu1 }
 0x17b   :  { %v330_v13 = vmax.f32 %v327_v11, 0.0 }
 0x17d   :  { %1792 = vmatmul.mubr.msk.f32.vlgmr.msra.gmra.mxu1 %vm342_vm3, %v330_v13 }
 0x17e   :  { %1795 = vmatpush3.msra.mxu1 %v420_v14  ;;  %1802 = vmatprep.mubr.msk.f32.mxu1 %vm2410_vm0, %v2409_v0  ;;  %v1626_v14 = vld [vmem:[#allocation19] ss:$0 sm:$0xff] }
 0x17f   :  { %1796 = vmatprep.subr.mxu1 %v2409_v0 }
 0x180   :  { %1797 = vmatpush3.msra.mxu1 %v419_v15 }
 0x181   :  { %1798 = vmatprep.subr.mxu1 %v2409_v0 }
 0x182   :  { %1799 = vmatpush3.msra.mxu1 %v418_v16  ;;  %v869_v16 = vld [vmem:[%s2837_s16] sm:$0xff] }
 0x183   :  { %1800 = vmatprep.subr.mxu1 %v2409_v0 }
 0x184   :  { %1801 = vmatpush3.msra.mxu1 %v417_v17 }
 0x185   :  { %1805 = vmatprep.subr.mxu1 %v2409_v0 }
 0x23d   :  { %v412_v19 = vpop.f32.mrf.mxu1 }
 0x23e   :  { %v413_v20 = vadd.f32 %v1618_v18, %v412_v19 }
 0x23f   :  { %v1793_v21 = vpop.f32.mrf.mxu1 }
 0x240   :  { %v416_v22 = vmax.f32 %v413_v20, 0.0  ;;  %v2649_v20 = vand.u32 127, %v604_v5  ;;  %v1008_v5 = vld [vmem:[#allocation18 + $0x98] sm:$0xff] }
 0x242   :  { %1803 = vmatmul.mubr.msk.f32.vlgmr.msra.gmra.mxu1 %vm342_vm3, %v416_v22 }
 0x243   :  { %1806 = vmatpush3.msra.mxu1 %v505_v23  ;;  %1813 = vmatprep.mubr.msk.f32.mxu1 %vm2410_vm0, %v2409_v0 }
 0x244   :  { %1807 = vmatprep.subr.mxu1 %v2409_v0 }
 0x245   :  { %1808 = vmatpush3.msra.mxu1 %v504_v24 }
 0x246   :  { %1809 = vmatprep.subr.mxu1 %v2409_v0 }
 0x247   :  { %1810 = vmatpush3.msra.mxu1 %v503_v25 }
 0x248   :  { %1811 = vmatprep.subr.mxu1 %v2409_v0 }
 0x249   :  { %1812 = vmatpush3.msra.mxu1 %v502_v26 }
 0x24a   :  { %722 = vmatprep.subr.mxu1 %v601_v28 }
 0x302   :  { %v497_v34 = vpop.f32.mrf.mxu1 }
 0x303   :  { %v498_v35 = vadd.f32 %v1620_v33, %v497_v34  ;;  %v928_v33 = vld [vmem:[#allocation16 + $0xe0] sm:$0xff]  ;;  %v927_v34 = vld [vmem:[#allocation16 + $0xd8] sm:$0xff] }
 0x304   :  { %v1804_v36 = vpop.f32.mrf.mxu1 }
 0x305   :  { %v501_v37 = vmax.f32 %v498_v35, 0.0  ;;  %v926_v35 = vld [vmem:[#allocation16 + $0xd0] sm:$0xff]  ;;  %v925_v36 = vld [vmem:[#allocation16 + $0xc8] sm:$0xff] }
 0x307   :  { %1814 = vmatmul.mubr.msk.f32.vlgmr.msra.gmra.mxu1 %vm342_vm3, %v501_v37  ;;  %v924_v37 = vld [vmem:[#allocation16 + $0xc0] sm:$0xff] }
 0x308   :  { %723 = vmatpush1.msra.mxu1 %v600_v38  ;;  %762 = vmatprep.mubr.f32.mxu1 %v2409_v0  ;;  %v923_v38 = vld [vmem:[#allocation16 + $0xb8] sm:$0xff] }
 0x309   :  { %724 = vmatprep.subr.mxu1 %v597_v39  ;;  %v922_v39 = vld [vmem:[#allocation16 + $0xb0] sm:$0xff] }
 0x30a   :  { %725 = vmatpush1.msra.mxu1 %v596_v40  ;;  %v921_v40 = vld [vmem:[#allocation16 + $0xa8] sm:$0xff] }
 0x30b   :  { %726 = vmatprep.subr.mxu1 %v593_v41  ;;  %v920_v41 = vld [vmem:[#allocation16 + $0xa0] sm:$0xff] }
 0x30c   :  { %727 = vmatpush1.msra.mxu1 %v592_v43  ;;  %v918_v43 = vld [vmem:[#allocation16 + $0x90] sm:$0xff] }
 0x30d   :  { %728 = vmatprep.subr.mxu1 %v589_v45 }
 0x30e   :  { %729 = vmatpush1.msra.mxu1 %v588_v47 }
 0x30f   :  { %1851 = vmatprep.subr.mxu1 %v2409_v0 }
 0x3c7   :  { %v582_v49 = vpop.f32.mrf.mxu1 }
 0x3c8   :  { %v583_v50 = vadd.f32 %v1622_v48, %v582_v49  ;;  %v2669_v49 = vld [vmem:[%s2838_s17] sm:$0xff] }
 0x3c9   :  { %v1815_v52 = vpop.f32.mrf.mxu1 }
 0x3ca   :  { %1624 = vmatmul.mubr.msk.f32.vlgmr.msra.gmra.mxu0 %vm342_vm3, %v583_v50  ;;  %1625 = vmatmul.mubr.msk.f32.vlgmr.msra.gmra.mxu1 %vm342_vm3, %v583_v50 }
 0x3cb   :  { %1817 = vmatpush3.msra.mxu0 %v791_v51  ;;  %1848 = vmatprep.mubr.msk.f32.mxu0 %vm2410_vm0, %v2409_v0 }
 0x3cc   :  { %1818 = vmatprep.subr.mxu0 %v2409_v0  ;;  %1883 = vmatprep.mubr.msk.f32.mxu1 %vm2410_vm0, %v2409_v0 }
 0x3cd   :  { %1819 = vmatpush3.msra.mxu0 %v790_v53  ;;  %1852 = vmatpush3.msra.mxu1 %v931_v30  ;;  %v917_v53 = vld [vmem:[#allocation16 + $0x88] sm:$0xff] }
 0x3ce   :  { %1820 = vmatprep.subr.mxu0 %v2409_v0  ;;  %1853 = vmatprep.subr.mxu1 %v2409_v0 }
 0x3cf   :  { %1821 = vmatpush3.msra.mxu0 %v789_v54  ;;  %1854 = vmatpush3.msra.mxu1 %v930_v31  ;;  %v1629_v31 = vld [vmem:[%s2837_s16 + $0x8] sm:$0xff] }
 0x3d0   :  { %1822 = vmatprep.subr.mxu0 %v2409_v0  ;;  %1855 = vmatprep.subr.mxu1 %v2409_v0 }
 0x3d1   :  { %1823 = vmatpush3.msra.mxu0 %v788_v55  ;;  %1856 = vmatpush3.msra.mxu1 %v929_v32  ;;  %v916_v55 = vld [vmem:[#allocation16 + $0x80] sm:$0xff] }
 0x3d2   :  { %1824 = vmatprep.subr.mxu0 %v2409_v0  ;;  %1857 = vmatprep.subr.mxu1 %v2409_v0 }
 0x3d3   :  { %1825 = vmatpush3.msra.mxu0 %v787_v56  ;;  %1858 = vmatpush3.msra.mxu1 %v928_v33  ;;  %v1020_v56 = vld [vmem:[#allocation18 + $0xf8] sm:$0xff] }
 0x3d4   :  { %1826 = vmatprep.subr.mxu0 %v2409_v0  ;;  %1859 = vmatprep.subr.mxu1 %v2409_v0 }
 0x3d5   :  { %1827 = vmatpush3.msra.mxu0 %v786_v57  ;;  %1860 = vmatpush3.msra.mxu1 %v927_v34  ;;  %v1019_v57 = vld [vmem:[#allocation18 + $0xf0] sm:$0xff] }
 0x3d6   :  { %1828 = vmatprep.subr.mxu0 %v2409_v0  ;;  %1861 = vmatprep.subr.mxu1 %v2409_v0 }
 0x3d7   :  { %1829 = vmatpush3.msra.mxu0 %v785_v58  ;;  %1862 = vmatpush3.msra.mxu1 %v926_v35  ;;  %v1018_v58 = vld [vmem:[#allocation18 + $0xe8] sm:$0xff] }
 0x3d8   :  { %1830 = vmatprep.subr.mxu0 %v2409_v0  ;;  %1863 = vmatprep.subr.mxu1 %v2409_v0 }
 0x3d9   :  { %1831 = vmatpush3.msra.mxu0 %v784_v59  ;;  %1864 = vmatpush3.msra.mxu1 %v925_v36  ;;  %v1017_v59 = vld [vmem:[#allocation18 + $0xe0] sm:$0xff] }
 0x3da   :  { %1832 = vmatprep.subr.mxu0 %v2409_v0  ;;  %1865 = vmatprep.subr.mxu1 %v2409_v0 }
 0x3db   :  { %1833 = vmatpush3.msra.mxu0 %v783_v60  ;;  %1866 = vmatpush3.msra.mxu1 %v924_v37  ;;  %v1016_v60 = vld [vmem:[#allocation18 + $0xd8] sm:$0xff] }
 0x3dc   :  { %1834 = vmatprep.subr.mxu0 %v2409_v0  ;;  %1867 = vmatprep.subr.mxu1 %v2409_v0 }
 0x3dd   :  { %1835 = vmatpush3.msra.mxu0 %v782_v61  ;;  %1868 = vmatpush3.msra.mxu1 %v923_v38  ;;  %v1015_v61 = vld [vmem:[#allocation18 + $0xd0] sm:$0xff] }
 0x3de   :  { %1836 = vmatprep.subr.mxu0 %v2409_v0  ;;  %1869 = vmatprep.subr.mxu1 %v2409_v0 }
 0x3df   :  { %1837 = vmatpush3.msra.mxu0 %v781_v62  ;;  %1870 = vmatpush3.msra.mxu1 %v922_v39  ;;  %v1014_v62 = vld [vmem:[#allocation18 + $0xc8] sm:$0xff] }
 0x3e0   :  { %1838 = vmatprep.subr.mxu0 %v2409_v0  ;;  %1871 = vmatprep.subr.mxu1 %v2409_v0 }
 0x3e1   :  { %1839 = vmatpush3.msra.mxu0 %v780_v63  ;;  %1872 = vmatpush3.msra.mxu1 %v921_v40  ;;  %v1013_v63 = vld [vmem:[#allocation18 + $0xc0] sm:$0xff] }
 0x3e2   :  { %1840 = vmatprep.subr.mxu0 %v2409_v0  ;;  %1873 = vmatprep.subr.mxu1 %v2409_v0 }
 0x3e3   :  { %1841 = vmatpush3.msra.mxu0 %v779_v1  ;;  %1874 = vmatpush3.msra.mxu1 %v920_v41  ;;  %v1012_v1 = vld [vmem:[#allocation18 + $0xb8] sm:$0xff] }
 0x3e4   :  { %1842 = vmatprep.subr.mxu0 %v2409_v0  ;;  %1875 = vmatprep.subr.mxu1 %v2409_v0 }
 0x3e5   :  { %1843 = vmatpush3.msra.mxu0 %v778_v2  ;;  %1876 = vmatpush3.msra.mxu1 %v919_v42  ;;  %v1011_v2 = vld [vmem:[#allocation18 + $0xb0] sm:$0xff]  ;;  %v2412_v42 = vmov 1  }
 0x3e6   :  { %1844 = vmatprep.subr.mxu0 %v2409_v0  ;;  %1877 = vmatprep.subr.mxu1 %v2409_v0 }
 0x3e7   :  { %1845 = vmatpush3.msra.mxu0 %v777_v3  ;;  %1878 = vmatpush3.msra.mxu1 %v918_v43  ;;  %v1010_v3 = vld [vmem:[#allocation18 + $0xa8] sm:$0xff]  ;;  %v1166_v43 = vld [vmem:[#allocation16 + $0x178] sm:$0xff] }
 0x3e8   :  { %1846 = vmatprep.subr.mxu0 %v2409_v0  ;;  %1879 = vmatprep.subr.mxu1 %v2409_v0 }
 0x3e9   :  { %1847 = vmatpush3.msra.mxu0 %v776_v4  ;;  %1880 = vmatpush3.msra.mxu1 %v917_v53  ;;  %v1009_v4 = vld [vmem:[#allocation18 + $0xa0] sm:$0xff]  ;;  %v1157_v53 = vld [vmem:[#allocation16 + $0x130] sm:$0xff] }
 0x3ea   :  { %1886 = vmatprep.subr.mxu0 %v2409_v0  ;;  %1881 = vmatprep.subr.mxu1 %v2409_v0 }
 0x3eb   :  { %1882 = vmatpush3.msra.mxu1 %v916_v55  ;;  %2089 = vset.pattern.permute.xlu0 %v2412_v42  ;;  %v1155_v55 = vld [vmem:[#allocation16 + $0x120] sm:$0xff] }
 0x3ec   :  { %1921 = vmatprep.subr.mxu1 %v2409_v0 }
 0x48a   :  { %v693_v10 = vpop.f32.mrf.mxu0 }
 0x48b   :  { %v694_v11 = vadd.f32 %v693_v10, %v607_v9  ;;  %v769_v9 = vld [vmem:[#allocation21] sm:$0x7] }
 0x48c   :  { %v2644_v13 = vpop.f32.mrf.mxu0  ;;  %v906_v10 = vrot.slane %v769_v9, %v2636_v7  ;;  %v1255_v9 = vld [vmem:[#allocation18 + $0x178] sm:$0xff] }
 0x48d   :  { %v775_v12 = vmax.f32 %v694_v11, 0.0  ;;  %v1627_v11 = vld [vmem:[#allocation22] ss:$0 sm:$0xff] }
 0x48f   :  { %1849 = vmatmul.mubr.f32.vlgmr.msra.gmra.mxu0 %v775_v12 }
 0x490   :  { %1918 = vmatprep.mubr.msk.f32.mxu0 %vm2410_vm0, %v2409_v0  ;;  %1887 = vmatpush3.msra.mxu0 %v1020_v56  ;;  %v1154_v56 = vld [vmem:[#allocation16 + $0x118] sm:$0xff] }
 0x491   :  { %1888 = vmatprep.subr.mxu0 %v2409_v0 }
 0x492   :  { %1889 = vmatpush3.msra.mxu0 %v1019_v57  ;;  %v1153_v57 = vld [vmem:[#allocation16 + $0x110] sm:$0xff] }
 0x493   :  { %1890 = vmatprep.subr.mxu0 %v2409_v0 }
 0x494   :  { %1891 = vmatpush3.msra.mxu0 %v1018_v58 }
 0x495   :  { %1892 = vmatprep.subr.mxu0 %v2409_v0 }
 0x496   :  { %1893 = vmatpush3.msra.mxu0 %v1017_v59 }
 0x497   :  { %1894 = vmatprep.subr.mxu0 %v2409_v0 }
 0x498   :  { %1895 = vmatpush3.msra.mxu0 %v1016_v60 }
 0x499   :  { %1896 = vmatprep.subr.mxu0 %v2409_v0 }
 0x49a   :  { %1897 = vmatpush3.msra.mxu0 %v1015_v61 }
 0x49b   :  { %1898 = vmatprep.subr.mxu0 %v2409_v0 }
 0x49c   :  { %1899 = vmatpush3.msra.mxu0 %v1014_v62 }
 0x49d   :  { %1900 = vmatprep.subr.mxu0 %v2409_v0 }
 0x49e   :  { %1901 = vmatpush3.msra.mxu0 %v1013_v63 }
 0x49f   :  { %1902 = vmatprep.subr.mxu0 %v2409_v0 }
 0x4a0   :  { %1903 = vmatpush3.msra.mxu0 %v1012_v1 }
 0x4a1   :  { %1904 = vmatprep.subr.mxu0 %v2409_v0 }
 0x4a2   :  { %1905 = vmatpush3.msra.mxu0 %v1011_v2 }
 0x4a3   :  { %1906 = vmatprep.subr.mxu0 %v2409_v0 }
 0x4a4   :  { %1907 = vmatpush3.msra.mxu0 %v1010_v3  ;;  %v1152_v3 = vld [vmem:[#allocation16 + $0x108] sm:$0xff] }
 0x4a5   :  { %1908 = vmatprep.subr.mxu0 %v2409_v0 }
 0x4a6   :  { %1909 = vmatpush3.msra.mxu0 %v1009_v4 }
 0x4a7   :  { %1910 = vmatprep.subr.mxu0 %v2409_v0 }
 0x4a8   :  { %1911 = vmatpush3.msra.mxu0 %v1008_v5  ;;  %v1151_v5 = vld [vmem:[#allocation16 + $0x100] sm:$0xff] }
 0x4a9   :  { %1912 = vmatprep.subr.mxu0 %v2409_v0 }
 0x54f   :  { %v865_v15 = vpop.f32.mrf.mxu0 }
 0x550   :  { %v866_v17 = vadd.f32 %v1626_v14, %v865_v15 }
 0x551   :  { %v1850_v18 = vpop.f32.mrf.mxu0 }
 0x552   :  { %v870_v19 = vadd.f32 %v869_v16, %v866_v17  ;;  %v1007_v16 = vld [vmem:[#allocation18 + $0x90] sm:$0xff]  ;;  %v1006_v17 = vld [vmem:[#allocation18 + $0x88] sm:$0xff]  ;;  %v1005_v18 = vld [vmem:[#allocation18 + $0x80] sm:$0xff] }
 0x553   :  { %1913 = vmatpush3.msra.mxu0 %v1007_v16  ;;  %v1250_v16 = vld [vmem:[#allocation18 + $0x150] sm:$0xff] }
 0x554   :  { %871 = vmax.xlane.f32.xlu0 %v870_v19  ;;  %1914 = vmatprep.subr.mxu0 %v2409_v0 }
 0x555   :  { %1915 = vmatpush3.msra.mxu0 %v1006_v17  ;;  %v1249_v17 = vld [vmem:[#allocation18 + $0x148] sm:$0xff] }
 0x556   :  { %1916 = vmatprep.subr.mxu0 %v2409_v0 }
 0x557   :  { %1917 = vmatpush3.msra.mxu0 %v1005_v18  ;;  %v1248_v18 = vld [vmem:[#allocation18 + $0x140] sm:$0xff] }
 0x558   :  { %1956 = vmatprep.subr.mxu0 %v2409_v0 }
 0x5dd   :  { %v872_v21 = vpop.xlane.xlu0 %871 }
 0x5de   :  { %vm875_vm4 = vcmp.ge.f32.partialorder %v870_v19, %v872_v21  ;;  %v2700_v19 = vsub.s32 1, %v2633_v6  ;;  %v2702_v21 = vpop.f32.mrf.mxu1 }
 0x5df   :  { %v876_v22 = vsel %vm875_vm4, %v2649_v20, 128 }
 0x5e0   :  { %v878_v23 = vshra.s32 %v876_v22, 16  ;;  %v877_v25 = vand.u32 65535, %v876_v22  ;;  %v611_v22 = vrot.slane %v2638_v8, %v2700_v19 }
 0x5e2   :  { %v880_v24 = vcvt.s32.f32 %v878_v23  ;;  %v879_v27 = vcvt.s32.f32 %v877_v25  ;;  %v2706_v23 = vpop.f32.mrf.mxu1 }
 0x5e4   :  { %881 = vmin.xlane.f32.xlu0 %v880_v24 }
 0x66d   :  { %v882_v26 = vpop.xlane.xlu0 %881 }
 0x66e   :  { %vm883_vm5 = vcmp.eq.f32.partialorder %v880_v24, %v882_v26  ;;  %v888_v44 = vcvt.f32.s32 %v882_v26  ;;  %v696_v24 = vadd.f32 %v2644_v13, %v611_v22  ;;  %v1247_v22 = vld [vmem:[#allocation18 + $0x138] sm:$0xff] }
 0x66f   :  { %v884_v28 = vsel %vm883_vm5, %v879_v27, inf }
 0x670   :  { %885 = vmin.xlane.f32.xlu1 %v884_v28  ;;  %v889_v46 = vshll.u32 %v888_v44, 16  ;;  %v1165_v44 = vld [vmem:[#allocation16 + $0x170] sm:$0xff] }
 0x6f9   :  { %v886_v45 = vpop.xlane.xlu1 %885 }
 0x6fa   :  { %v887_v47 = vcvt.f32.s32 %v886_v45  ;;  %v1164_v45 = vld [vmem:[#allocation16 + $0x168] sm:$0xff] }
 0x6fc   :  { %v890_v48 = vadd.s32 %v889_v46, %v887_v47  ;;  %v1163_v46 = vld [vmem:[#allocation16 + $0x160] sm:$0xff]  ;;  %v1162_v47 = vld [vmem:[#allocation16 + $0x158] sm:$0xff] }
 0x6fe   :  { %v891_v50 = vcvt.s32.f32 %v890_v48  ;;  %v1161_v48 = vld [vmem:[#allocation16 + $0x150] sm:$0xff] }
 0x700   :  { %v893_v51 = vadd.f32 %v2669_v49, %v891_v50  ;;  %v1160_v50 = vld [vmem:[#allocation16 + $0x148] sm:$0xff] }
 0x702   :  { %v894_v52 = vmul.f32 0.025, %v893_v51  ;;  %v1159_v51 = vld [vmem:[#allocation16 + $0x140] sm:$0xff] }
 0x704   :  { %v895_v54 = vadd.f32 -1.0, %v894_v52  ;;  %v1158_v52 = vld [vmem:[#allocation16 + $0x138] sm:$0xff] }
 0x706   :  { %900 = vperm.xlu1 %2088, %v895_v54   ;;  %897 = vst.msk [vmem:[%s2839_s18] sm:$0xff] %vm896_vm6, %v895_v54  ;;  %v1156_v54 = vld [vmem:[#allocation16 + $0x128] sm:$0xff] }
 0x781   :  { %v2691_v12 = vpop.permute.xlu1 %900 }
 0x782   :  { %v907_v14 = vmul.f32 %v906_v10, %v2691_v12  ;;  %v1254_v10 = vld [vmem:[#allocation18 + $0x170] sm:$0xff] }
 0x784   :  { %v914_v15 = vadd.f32 %v1627_v11, %v907_v14  ;;  %v1253_v11 = vld [vmem:[#allocation18 + $0x168] sm:$0xff]  ;;  %v1252_v14 = vld [vmem:[#allocation18 + $0x160] sm:$0xff] }
 0x786   :  { %1884 = vmatmul.mubr.f32.vlgmr.msra.gmra.mxu1 %v914_v15  ;;  %v1251_v15 = vld [vmem:[#allocation18 + $0x158] sm:$0xff] }
 0x787   :  { %1953 = vmatprep.mubr.msk.f32.mxu1 %vm2410_vm0, %v2409_v0  ;;  %1922 = vmatpush3.msra.mxu1 %v1166_v43 }
 0x788   :  { %1923 = vmatprep.subr.mxu1 %v2409_v0 }
 0x789   :  { %1924 = vmatpush3.msra.mxu1 %v1165_v44 }
 0x78a   :  { %1925 = vmatprep.subr.mxu1 %v2409_v0 }
 0x78b   :  { %1926 = vmatpush3.msra.mxu1 %v1164_v45 }
 0x78c   :  { %1927 = vmatprep.subr.mxu1 %v2409_v0 }
 0x78d   :  { %1928 = vmatpush3.msra.mxu1 %v1163_v46  ;;  %v1631_v46 = vld [vmem:[#allocation19 + $0x2] ss:$0 sm:$0xff] }
 0x78e   :  { %1929 = vmatprep.subr.mxu1 %v2409_v0 }
 0x78f   :  { %1930 = vmatpush3.msra.mxu1 %v1162_v47 }
 0x790   :  { %1931 = vmatprep.subr.mxu1 %v2409_v0 }
 0x791   :  { %1932 = vmatpush3.msra.mxu1 %v1161_v48  ;;  %v1632_v48 = vld [vmem:[%s2837_s16 + $0x10] sm:$0xff] }
 0x792   :  { %1933 = vmatprep.subr.mxu1 %v2409_v0 }
 0x793   :  { %1934 = vmatpush3.msra.mxu1 %v1160_v50 }
 0x794   :  { %1935 = vmatprep.subr.mxu1 %v2409_v0 }
 0x795   :  { %1936 = vmatpush3.msra.mxu1 %v1159_v51 }
 0x796   :  { %1937 = vmatprep.subr.mxu1 %v2409_v0 }
 0x797   :  { %1938 = vmatpush3.msra.mxu1 %v1158_v52 }
 0x798   :  { %1939 = vmatprep.subr.mxu1 %v2409_v0 }
 0x799   :  { %1940 = vmatpush3.msra.mxu1 %v1157_v53 }
 0x79a   :  { %1941 = vmatprep.subr.mxu1 %v2409_v0 }
 0x79b   :  { %1942 = vmatpush3.msra.mxu1 %v1156_v54 }
 0x79c   :  { %1943 = vmatprep.subr.mxu1 %v2409_v0 }
 0x79d   :  { %1944 = vmatpush3.msra.mxu1 %v1155_v55 }
 0x79e   :  { %1945 = vmatprep.subr.mxu1 %v2409_v0 }
 0x79f   :  { %1946 = vmatpush3.msra.mxu1 %v1154_v56 }
 0x7a0   :  { %1947 = vmatprep.subr.mxu1 %v2409_v0 }
 0x7a1   :  { %1948 = vmatpush3.msra.mxu1 %v1153_v57 }
 0x7a2   :  { %1949 = vmatprep.subr.mxu1 %v2409_v0 }
 0x7a3   :  { %1950 = vmatpush3.msra.mxu1 %v1152_v3  ;;  %v1402_v3 = vld [vmem:[#allocation16 + $0x1d0] sm:$0xff] }
 0x7a4   :  { %1951 = vmatprep.subr.mxu1 %v2409_v0 }
 0x7a5   :  { %1952 = vmatpush3.msra.mxu1 %v1151_v5  ;;  %v1400_v5 = vld [vmem:[#allocation16 + $0x1c0] sm:$0xff] }
 0x7a6   :  { %1991 = vmatprep.subr.mxu1 %v2409_v0 }
 0x846   :  { %v998_v25 = vpop.f32.mrf.mxu1 }
 0x847   :  { %v1002_v26 = vadd.f32 %v998_v25, %v696_v24  ;;  %v1246_v24 = vld [vmem:[#allocation18 + $0x130] sm:$0xff]  ;;  %v1245_v25 = vld [vmem:[#allocation18 + $0x128] sm:$0xff] }
 0x848   :  { %v1885_v27 = vpop.f32.mrf.mxu1 }
 0x849   :  { %v1003_v28 = vmax.f32 %v1002_v26, 0.0  ;;  %v1244_v26 = vld [vmem:[#allocation18 + $0x120] sm:$0xff]  ;;  %v1243_v27 = vld [vmem:[#allocation18 + $0x118] sm:$0xff] }
 0x84b   :  { %1919 = vmatmul.mubr.f32.vlgmr.msra.gmra.mxu0 %v1003_v28  ;;  %v770_v28 = vld [vmem:[#allocation21 + $0x4] sm:$0x7] }
 0x84c   :  { %1988 = vmatprep.mubr.msk.f32.mxu0 %vm2410_vm0, %v2409_v0  ;;  %1957 = vmatpush3.msra.mxu0 %v1255_v9  ;;  %v1399_v9 = vld [vmem:[#allocation16 + $0x1b8] sm:$0xff] }
 0x84d   :  { %1958 = vmatprep.subr.mxu0 %v2409_v0 }
 0x84e   :  { %1959 = vmatpush3.msra.mxu0 %v1254_v10  ;;  %v1398_v10 = vld [vmem:[#allocation16 + $0x1b0] sm:$0xff] }
 0x84f   :  { %1960 = vmatprep.subr.mxu0 %v2409_v0 }
 0x850   :  { %1961 = vmatpush3.msra.mxu0 %v1253_v11  ;;  %v1397_v11 = vld [vmem:[#allocation16 + $0x1a8] sm:$0xff] }
 0x851   :  { %1962 = vmatprep.subr.mxu0 %v2409_v0 }
 0x852   :  { %1963 = vmatpush3.msra.mxu0 %v1252_v14  ;;  %v1396_v14 = vld [vmem:[#allocation16 + $0x1a0] sm:$0xff] }
 0x853   :  { %1964 = vmatprep.subr.mxu0 %v2409_v0 }
 0x854   :  { %1965 = vmatpush3.msra.mxu0 %v1251_v15  ;;  %v1395_v15 = vld [vmem:[#allocation16 + $0x198] sm:$0xff] }
 0x855   :  { %1966 = vmatprep.subr.mxu0 %v2409_v0 }
 0x856   :  { %1967 = vmatpush3.msra.mxu0 %v1250_v16  ;;  %v1394_v16 = vld [vmem:[#allocation16 + $0x190] sm:$0xff] }
 0x857   :  { %1968 = vmatprep.subr.mxu0 %v2409_v0 }
 0x858   :  { %1969 = vmatpush3.msra.mxu0 %v1249_v17 }
 0x859   :  { %1970 = vmatprep.subr.mxu0 %v2409_v0 }
 0x85a   :  { %1971 = vmatpush3.msra.mxu0 %v1248_v18 }
 0x85b   :  { %1972 = vmatprep.subr.mxu0 %v2409_v0 }
 0x85c   :  { %1973 = vmatpush3.msra.mxu0 %v1247_v22 }
 0x85d   :  { %1974 = vmatprep.subr.mxu0 %v2409_v0 }
 0x85e   :  { %1975 = vmatpush3.msra.mxu0 %v1246_v24 }
 0x85f   :  { %1976 = vmatprep.subr.mxu0 %v2409_v0 }
 0x860   :  { %1977 = vmatpush3.msra.mxu0 %v1245_v25 }
 0x861   :  { %1978 = vmatprep.subr.mxu0 %v2409_v0 }
 0x862   :  { %1979 = vmatpush3.msra.mxu0 %v1244_v26 }
 0x863   :  { %1980 = vmatprep.subr.mxu0 %v2409_v0 }
 0x864   :  { %1981 = vmatpush3.msra.mxu0 %v1243_v27 }
 0x865   :  { %1982 = vmatprep.subr.mxu0 %v2409_v0 }
 0x90b   :  { %v1095_v30 = vpop.f32.mrf.mxu0 }
 0x90c   :  { %v1096_v32 = vadd.f32 %v1628_v29, %v1095_v30  ;;  %v1130_v29 = vrot.slane %v770_v28, %v2636_v7 }
 0x90d   :  { %v1920_v33 = vpop.f32.mrf.mxu0 }
 0x90e   :  { %v1101_v34 = vadd.f32 %v1629_v31, %v1096_v32  ;;  %v1131_v30 = vmul.f32 %v1130_v29, %v2691_v12  ;;  %v1147_v31 = vrot.slane %v770_v28, %v2700_v19  ;;  %v1630_v32 = vld [vmem:[#allocation22 + $0x1] ss:$0 sm:$0xff]  ;;  %v1393_v29 = vld [vmem:[#allocation16 + $0x188] sm:$0xff] }
 0x910   :  { %1102 = vmax.xlane.f32.xlu0 %v1101_v34 }
 0x999   :  { %v1103_v35 = vpop.xlane.xlu0 %1102 }
 0x99a   :  { %vm1104_vm7 = vcmp.ge.f32.partialorder %v1101_v34, %v1103_v35  ;;  %v1138_v34 = vadd.f32 %v1630_v32, %v1131_v30  ;;  %v1496_v32 = vld [vmem:[#allocation18 + $0x1f8] sm:$0xff] }
 0x99b   :  { %v1105_v13 = vsel %vm1104_vm7, %v2649_v20, 128 }
 0x99c   :  { %v1107_v36 = vshra.s32 %v1105_v13, 16  ;;  %v1106_v38 = vand.u32 65535, %v1105_v13 }
 0x99e   :  { %v1109_v37 = vcvt.s32.f32 %v1107_v36  ;;  %v1108_v40 = vcvt.s32.f32 %v1106_v38  ;;  %v1242_v36 = vld [vmem:[#allocation18 + $0x110] sm:$0xff]  ;;  %v1240_v38 = vld [vmem:[#allocation18 + $0x100] sm:$0xff] }
 0x99f   :  { %1983 = vmatpush3.msra.mxu0 %v1242_v36  ;;  %v1492_v36 = vld [vmem:[#allocation18 + $0x1d8] sm:$0xff] }
 0x9a0   :  { %1110 = vmin.xlane.f32.xlu0 %v1109_v37  ;;  %1984 = vmatprep.subr.mxu0 %v2409_v0 }
 0xa29   :  { %v1111_v39 = vpop.xlane.xlu0 %1110 }
 0xa2a   :  { %vm1112_vm8 = vcmp.eq.f32.partialorder %v1109_v37, %v1111_v39  ;;  %v1117_v58 = vcvt.f32.s32 %v1111_v39  ;;  %v1241_v37 = vld [vmem:[#allocation18 + $0x108] sm:$0xff]  ;;  %v614_v39 = vsub.s32 2, %v2633_v6 }
 0xa2b   :  { %v1113_v41 = vsel %vm1112_vm8, %v1108_v40, inf  ;;  %1985 = vmatpush3.msra.mxu0 %v1241_v37  ;;  %v1491_v37 = vld [vmem:[#allocation18 + $0x1d0] sm:$0xff] }
 0xa2c   :  { %1114 = vmin.xlane.f32.xlu0 %v1113_v41  ;;  %v1118_v60 = vshll.u32 %v1117_v58, 16  ;;  %1986 = vmatprep.subr.mxu0 %v2409_v0  ;;  %v615_v40 = vrot.slane %v2638_v8, %v614_v39 }
 0xa2d   :  { %1987 = vmatpush3.msra.mxu0 %v1240_v38  ;;  %v1490_v38 = vld [vmem:[#allocation18 + $0x1c8] sm:$0xff] }
 0xa2e   :  { %2026 = vmatprep.subr.mxu0 %v2409_v0  ;;  %v765_v41 = vadd.f32 %v2702_v21, %v615_v40  ;;  %v1489_v40 = vld [vmem:[#allocation18 + $0x1c0] sm:$0xff] }
 0xab5   :  { %v1115_v59 = vpop.xlane.xlu0 %1114 }
 0xab6   :  { %v1116_v61 = vcvt.f32.s32 %v1115_v59 }
 0xab8   :  { %v1119_v62 = vadd.s32 %v1118_v60, %v1116_v61  ;;  %v2413_v60 = vmov 2   ;;  %v1407_v61 = vld [vmem:[#allocation16 + $0x1f8] sm:$0xff] }
 0xaba   :  { %v1120_v63 = vcvt.s32.f32 %v1119_v62  ;;  %v1406_v62 = vld [vmem:[#allocation16 + $0x1f0] sm:$0xff] }
 0xabc   :  { %v1122_v1 = vadd.f32 %v1120_v63, %v2669_v49  ;;  %v1405_v63 = vld [vmem:[#allocation16 + $0x1e8] sm:$0xff] }
 0xabe   :  { %v1123_v2 = vmul.f32 0.025, %v1122_v1  ;;  %v1404_v1 = vld [vmem:[#allocation16 + $0x1e0] sm:$0xff] }
 0xac0   :  { %v1124_v4 = vadd.f32 -1.0, %v1123_v2  ;;  %v1403_v2 = vld [vmem:[#allocation16 + $0x1d8] sm:$0xff] }
 0xac2   :  { %1141 = vperm.xlu0 %2089, %v1124_v4   ;;  %1126 = vst.msk [vmem:[%s2839_s18] sm:$0xff] %vm1125_vm9, %v1124_v4  ;;  %v1401_v4 = vld [vmem:[#allocation16 + $0x1c8] sm:$0xff] }
 0xac6   :  { %2090 = vset.pattern.permute.xlu0 %v2413_v60 }
 0xb3d   :  { %v2751_v33 = vpop.permute.xlu0 %1141 }
 0xb3e   :  { %v1148_v35 = vmul.f32 %v1147_v31, %v2751_v33  ;;  %v1392_v31 = vld [vmem:[#allocation16 + $0x180] sm:$0xff] }
 0xb40   :  { %v1149_v13 = vadd.f32 %v1148_v35, %v1138_v34  ;;  %v1495_v34 = vld [vmem:[#allocation18 + $0x1f0] sm:$0xff]  ;;  %v1494_v35 = vld [vmem:[#allocation18 + $0x1e8] sm:$0xff] }
 0xb42   :  { %1954 = vmatmul.mubr.f32.vlgmr.msra.gmra.mxu1 %v1149_v13  ;;  %v1493_v13 = vld [vmem:[#allocation18 + $0x1e0] sm:$0xff] }
 0xb43   :  { %2023 = vmatprep.mubr.msk.f32.mxu1 %vm2410_vm0, %v2409_v0  ;;  %1992 = vmatpush3.msra.mxu1 %v1407_v61 }
 0xb44   :  { %1993 = vmatprep.subr.mxu1 %v2409_v0 }
 0xb45   :  { %1994 = vmatpush3.msra.mxu1 %v1406_v62 }
 0xb46   :  { %1995 = vmatprep.subr.mxu1 %v2409_v0 }
 0xb47   :  { %1996 = vmatpush3.msra.mxu1 %v1405_v63  ;;  %v1634_v63 = vld [vmem:[#allocation19 + $0x3] ss:$0 sm:$0xff] }
 0xb48   :  { %1997 = vmatprep.subr.mxu1 %v2409_v0 }
 0xb49   :  { %1998 = vmatpush3.msra.mxu1 %v1404_v1 }
 0xb4a   :  { %1999 = vmatprep.subr.mxu1 %v2409_v0 }
 0xb4b   :  { %2000 = vmatpush3.msra.mxu1 %v1403_v2  ;;  %v1635_v2 = vld [vmem:[%s2837_s16 + $0x18] sm:$0xff] }
 0xb4c   :  { %2001 = vmatprep.subr.mxu1 %v2409_v0 }
 0xb4d   :  { %2002 = vmatpush3.msra.mxu1 %v1402_v3 }
 0xb4e   :  { %2003 = vmatprep.subr.mxu1 %v2409_v0 }
 0xb4f   :  { %2004 = vmatpush3.msra.mxu1 %v1401_v4 }
 0xb50   :  { %2005 = vmatprep.subr.mxu1 %v2409_v0 }
 0xb51   :  { %2006 = vmatpush3.msra.mxu1 %v1400_v5 }
 0xb52   :  { %2007 = vmatprep.subr.mxu1 %v2409_v0 }
 0xb53   :  { %2008 = vmatpush3.msra.mxu1 %v1399_v9 }
 0xb54   :  { %2009 = vmatprep.subr.mxu1 %v2409_v0 }
 0xb55   :  { %2010 = vmatpush3.msra.mxu1 %v1398_v10 }
 0xb56   :  { %2011 = vmatprep.subr.mxu1 %v2409_v0 }
 0xb57   :  { %2012 = vmatpush3.msra.mxu1 %v1397_v11 }
 0xb58   :  { %2013 = vmatprep.subr.mxu1 %v2409_v0 }
 0xb59   :  { %2014 = vmatpush3.msra.mxu1 %v1396_v14 }
 0xb5a   :  { %2015 = vmatprep.subr.mxu1 %v2409_v0 }
 0xb5b   :  { %2016 = vmatpush3.msra.mxu1 %v1395_v15 }
 0xb5c   :  { %2017 = vmatprep.subr.mxu1 %v2409_v0 }
 0xb5d   :  { %2018 = vmatpush3.msra.mxu1 %v1394_v16 }
 0xb5e   :  { %2019 = vmatprep.subr.mxu1 %v2409_v0 }
 0xb5f   :  { %2020 = vmatpush3.msra.mxu1 %v1393_v29 }
 0xb60   :  { %2021 = vmatprep.subr.mxu1 %v2409_v0 }
 0xb61   :  { %2022 = vmatpush3.msra.mxu1 %v1392_v31 }
 0xc02   :  { %v1233_v42 = vpop.f32.mrf.mxu1 }
 0xc03   :  { %v1237_v43 = vadd.f32 %v1233_v42, %v765_v41  ;;  %v1488_v41 = vld [vmem:[#allocation18 + $0x1b8] sm:$0xff]  ;;  %v1487_v42 = vld [vmem:[#allocation18 + $0x1b0] sm:$0xff] }
 0xc04   :  { %v1955_v44 = vpop.f32.mrf.mxu1 }
 0xc05   :  { %v1238_v45 = vmax.f32 %v1237_v43, 0.0  ;;  %v1486_v43 = vld [vmem:[#allocation18 + $0x1a8] sm:$0xff]  ;;  %v1485_v44 = vld [vmem:[#allocation18 + $0x1a0] sm:$0xff] }
 0xc07   :  { %1989 = vmatmul.mubr.f32.vlgmr.msra.gmra.mxu0 %v1238_v45  ;;  %v1484_v45 = vld [vmem:[#allocation18 + $0x198] sm:$0xff] }
 0xc08   :  { %2058 = vmatprep.mubr.msk.f32.mxu0 %vm2410_vm0, %v2409_v0  ;;  %2027 = vmatpush3.msra.mxu0 %v1496_v32 }
 0xc09   :  { %2028 = vmatprep.subr.mxu0 %v2409_v0 }
 0xc0a   :  { %2029 = vmatpush3.msra.mxu0 %v1495_v34 }
 0xc0b   :  { %2030 = vmatprep.subr.mxu0 %v2409_v0 }
 0xc0c   :  { %2031 = vmatpush3.msra.mxu0 %v1494_v35 }
 0xc0d   :  { %2032 = vmatprep.subr.mxu0 %v2409_v0 }
 0xc0e   :  { %2033 = vmatpush3.msra.mxu0 %v1493_v13 }
 0xc0f   :  { %2034 = vmatprep.subr.mxu0 %v2409_v0 }
 0xc10   :  { %2035 = vmatpush3.msra.mxu0 %v1492_v36 }
 0xc11   :  { %2036 = vmatprep.subr.mxu0 %v2409_v0 }
 0xc12   :  { %2037 = vmatpush3.msra.mxu0 %v1491_v37 }
 0xc13   :  { %2038 = vmatprep.subr.mxu0 %v2409_v0 }
 0xc14   :  { %2039 = vmatpush3.msra.mxu0 %v1490_v38 }
 0xc15   :  { %2040 = vmatprep.subr.mxu0 %v2409_v0 }
 0xc16   :  { %2041 = vmatpush3.msra.mxu0 %v1489_v40 }
 0xc17   :  { %2042 = vmatprep.subr.mxu0 %v2409_v0 }
 0xc18   :  { %2043 = vmatpush3.msra.mxu0 %v1488_v41 }
 0xc19   :  { %2044 = vmatprep.subr.mxu0 %v2409_v0 }
 0xc1a   :  { %2045 = vmatpush3.msra.mxu0 %v1487_v42 }
 0xc1b   :  { %2046 = vmatprep.subr.mxu0 %v2409_v0 }
 0xc1c   :  { %2047 = vmatpush3.msra.mxu0 %v1486_v43 }
 0xc1d   :  { %2048 = vmatprep.subr.mxu0 %v2409_v0 }
 0xc1e   :  { %2049 = vmatpush3.msra.mxu0 %v1485_v44 }
 0xc1f   :  { %2050 = vmatprep.subr.mxu0 %v2409_v0 }
 0xc20   :  { %2051 = vmatpush3.msra.mxu0 %v1484_v45 }
 0xc21   :  { %2052 = vmatprep.subr.mxu0 %v2409_v0 }
 0xcc7   :  { %v1330_v47 = vpop.f32.mrf.mxu0 }
 0xcc8   :  { %v1331_v50 = vadd.f32 %v1631_v46, %v1330_v47  ;;  %v771_v46 = vld [vmem:[#allocation21 + $0x8] sm:$0x7] }
 0xcc9   :  { %v1990_v51 = vpop.f32.mrf.mxu0  ;;  %v1365_v47 = vrot.slane %v771_v46, %v2636_v7  ;;  %v1482_v7 = vld [vmem:[#allocation18 + $0x188] sm:$0xff] }
 0xcca   :  { %v1336_v52 = vadd.f32 %v1632_v48, %v1331_v50  ;;  %v1377_v48 = vrot.slane %v771_v46, %v2700_v19  ;;  %v1633_v51 = vld [vmem:[#allocation22 + $0x2] ss:$0 sm:$0xff]  ;;  %v618_v19 = vsub.s32 3, %v2633_v6 }
 0xccb   :  { %v1366_v50 = vmul.f32 %v1365_v47, %v2691_v12  ;;  %v1481_v12 = vld [vmem:[#allocation18 + $0x180] sm:$0xff] }
 0xccc   :  { %1337 = vmax.xlane.f32.xlu1 %v1336_v52 }
 0xd55   :  { %v1338_v53 = vpop.xlane.xlu1 %1337 }
 0xd56   :  { %vm1339_vm10 = vcmp.ge.f32.partialorder %v1336_v52, %v1338_v53  ;;  %v1378_v52 = vmul.f32 %v1377_v48, %v2751_v33  ;;  %v1388_v53 = vrot.slane %v771_v46, %v614_v39  ;;  %v619_v33 = vrot.slane %v2638_v8, %v618_v19 }
 0xd57   :  { %v1340_v21 = vsel %vm1339_vm10, %v2649_v20, 128 }
 0xd58   :  { %v1342_v54 = vshra.s32 %v1340_v21, 16  ;;  %v1341_v56 = vand.u32 65535, %v1340_v21  ;;  %v1373_v21 = vadd.f32 %v1633_v51, %v1366_v50  ;;  %v767_v39 = vadd.f32 %v2706_v23, %v619_v33 }
 0xd5a   :  { %v1344_v55 = vcvt.s32.f32 %v1342_v54  ;;  %v1343_v58 = vcvt.s32.f32 %v1341_v56 }
 0xd5c   :  { %1345 = vmin.xlane.f32.xlu1 %v1344_v55 }
 0xde5   :  { %v1346_v57 = vpop.xlane.xlu1 %1345 }
 0xde6   :  { %vm1347_vm11 = vcmp.eq.f32.partialorder %v1344_v55, %v1346_v57  ;;  %v1352_v17 = vcvt.f32.s32 %v1346_v57  ;;  %v1379_v55 = vadd.f32 %v1378_v52, %v1373_v21 }
 0xde7   :  { %v1348_v59 = vsel %vm1347_vm11, %v1343_v58, inf  ;;  %v1483_v58 = vld [vmem:[#allocation18 + $0x190] sm:$0xff] }
 0xde8   :  { %1349 = vmin.xlane.f32.xlu1 %v1348_v59  ;;  %v1353_v22 = vshll.u32 %v1352_v17, 16  ;;  %2053 = vmatpush3.msra.mxu0 %v1483_v58 }
 0xde9   :  { %2054 = vmatprep.subr.mxu0 %v2409_v0 }
 0xdea   :  { %2055 = vmatpush3.msra.mxu0 %v1482_v7 }
 0xdeb   :  { %2056 = vmatprep.subr.mxu0 %v2409_v0 }
 0xdec   :  { %2057 = vmatpush3.msra.mxu0 %v1481_v12 }
 0xe71   :  { %v1350_v18 = vpop.xlane.xlu1 %1349 }
 0xe72   :  { %v1351_v24 = vcvt.f32.s32 %v1350_v18 }
 0xe74   :  { %v1354_v25 = vadd.s32 %v1353_v22, %v1351_v24 }
 0xe76   :  { %v1355_v26 = vcvt.s32.f32 %v1354_v25 }
 0xe78   :  { %v1357_v27 = vadd.f32 %v1355_v26, %v2669_v49 }
 0xe7a   :  { %v1358_v28 = vmul.f32 0.025, %v1357_v27 }
 0xe7c   :  { %v1359_v30 = vadd.f32 -1.0, %v1358_v28 }
 0xe7e   :  { %1382 = vperm.xlu0 %2090, %v1359_v30   ;;  %1361 = vst.msk [vmem:[%s2839_s18] sm:$0xff] %vm1360_vm12, %v1359_v30 }
 0xef9   :  { %v1383_v54 = vpop.permute.xlu0 %1382 }
 0xefa   :  { %v1389_v56 = vmul.f32 %v1388_v53, %v1383_v54 }
 0xefc   :  { %v1390_v57 = vadd.f32 %v1389_v56, %v1379_v55 }
 0xefe   :  { %2024 = vmatmul.mubr.f32.vlgmr.msra.gmra.mxu1 %v1390_v57 }
 0xfbe   :  { %v1474_v59 = vpop.f32.mrf.mxu1 }
 0xfbf   :  { %v1478_v60 = vadd.f32 %v1474_v59, %v767_v39 }
 0xfc0   :  { %v2025_v61 = vpop.f32.mrf.mxu1 }
 0xfc1   :  { %v1479_v62 = vmax.f32 %v1478_v60, 0.0 }
 0xfc3   :  { %2059 = vmatmul.mubr.f32.vlgmr.msra.gmra.mxu0 %v1479_v62 }
0x1083   :  { %v1571_v1 = vpop.f32.mrf.mxu0 }
0x1084   :  { %v1572_v0 = vadd.f32 %v1634_v63, %v1571_v1 }
0x1085   :  { %v2060_v3 = vpop.f32.mrf.mxu0 }
0x1086   :  { %v1577_v4 = vadd.f32 %v1635_v2, %v1572_v0 }
0x1088   :  { %1578 = vmax.xlane.f32.xlu1 %v1577_v4 }
0x1111   :  { %v1579_v6 = vpop.xlane.xlu1 %1578 }
0x1112   :  { %vm1580_vm13 = vcmp.ge.f32.partialorder %v1577_v4, %v1579_v6 }
0x1113   :  { %v1581_v8 = vsel %vm1580_vm13, %v2649_v20, 128 }
0x1114   :  { %v1583_v23 = vshra.s32 %v1581_v8, 16  ;;  %v1582_v9 = vand.u32 65535, %v1581_v8 }
0x1116   :  { %v1585_v5 = vcvt.s32.f32 %v1583_v23  ;;  %v1584_v11 = vcvt.s32.f32 %v1582_v9 }
0x1118   :  { %1586 = vmin.xlane.f32.xlu1 %v1585_v5 }
0x11a1   :  { %v1587_v10 = vpop.xlane.xlu1 %1586 }
0x11a2   :  { %vm1588_vm14 = vcmp.eq.f32.partialorder %v1585_v5, %v1587_v10  ;;  %v1593_v15 = vcvt.f32.s32 %v1587_v10 }
0x11a3   :  { %v1589_v14 = vsel %vm1588_vm14, %v1584_v11, inf }
0x11a4   :  { %1590 = vmin.xlane.f32.xlu0 %v1589_v14  ;;  %v1594_v17 = vshll.u32 %v1593_v15, 16 }
0x122d   :  { %v1591_v16 = vpop.xlane.xlu0 %1590 }
0x122e   :  { %v1592_v18 = vcvt.f32.s32 %v1591_v16 }
0x1230   :  { %v1595_v22 = vadd.s32 %v1594_v17, %v1592_v18 }
0x1232   :  { %v1596_v24 = vcvt.s32.f32 %v1595_v22 }
0x1234   :  { %v1598_v25 = vadd.f32 %v1596_v24, %v2669_v49 }
0x1236   :  { %v1599_v26 = vmul.f32 0.025, %v1598_v25 }
0x1238   :  { %v1600_v20 = vadd.f32 -1.0, %v1599_v26 }
0x123a   :  { %1602 = vst.msk [vmem:[%s2839_s18] sm:$0xff] %vm1601_vm15, %v1600_v20 }
0x123b   :  { %1607 = vsyncpa [#allocation3], 1 }
0x123c   :  { %1608 = vsyncpa [#allocation5], 1 }
0x123d   :  { %1609 = vsyncpa [#allocation8], 1 }
0x123e   :  { %1610 = vsyncpa [#allocation11], 1 }
0x123f   :  { %1611 = vsyncpa [#allocation14], 1 }
0x1240   :  { %1612 = vsyncpa [#allocation17], 1 }
0x1241   :  { %1613 = vsyncpa [#allocation20], 1 }
0x1242   :  { %1614 = vsyncpa [#allocation23], 1 }

</bundles_post_ra>
